<compile_context>
chip_gen: v6e
topology: v6e:2x2x1
jax: 0.10.0
libtpu: 0.0.40
codegen_flags: <defaults>
</compile_context>

<pallas_src>
import functools

import jax
import jax.numpy as jnp
from jax.experimental import pallas as pl
from jax.experimental.pallas import tpu as pltpu


def _round_up(x, m):
    return ((x + m - 1) // m) * m


def _critic_kernel(x_ref, w1_ref, b1_ref, w2_ref, b2_ref, o_ref, *, chunk_rows):
    """One batch tile.

    x_ref:  (Rb, P*S)  packed states (P batch elements per lane-dense row)
    w1_ref: (P*S, P*H) block-diagonal layer-1 weights (resident)
    b1_ref: (1,  P*H)  tiled layer-1 bias             (resident)
    w2_ref: (P*H, P)   block-diagonal layer-2 weights (resident)
    b2_ref: (1, 1)     layer-2 bias (SMEM scalar)
    o_ref:  (Rb, P)    packed values
    """
    rows = x_ref.shape[0]
    c_rows = min(chunk_rows, rows)
    n_chunks = (rows + c_rows - 1) // c_rows

    w1 = w1_ref[...]
    b1 = b1_ref[...]
    w2 = w2_ref[...]
    b2 = b2_ref[0, 0]

    # Statically unrolled chunk loop: keeps the live hidden activation at
    # (c_rows, P*H) instead of (Rb, P*H).  The last chunk offset is clamped so
    # it stays in bounds; any overlap just recomputes identical rows.
    for c in range(n_chunks):
        off = min(c * c_rows, rows - c_rows)
        x = x_ref[pl.ds(off, c_rows), :]                         # (c, P*S)
        # Layer 1 on the MXU (f32 accumulation); bias + ReLU fused on the VPU.
        h = jnp.dot(x, w1, preferred_element_type=jnp.float32)   # (c, P*H)
        g = jnp.maximum(h + b1, 0.0)
        # Layer 2 as a second MXU matmul against block-diagonal w2 -- this is
        # also the per-element reduction, so no cross-lane XLU work is needed.
        v = jnp.dot(g, w2, preferred_element_type=jnp.float32)   # (c, P)
        o_ref[pl.ds(off, c_rows), :] = (v + b2).astype(o_ref.dtype)


def critic_forward(state, w1, b1, w2, b2, *, block_rows=2048, chunk_rows=256):
    """state: (B, state_dim) f32 -> value: (B, 1) f32.

    Equivalent to Linear(S,128) -> ReLU -> Linear(128,1).

    block_rows: packed rows per grid step (2048 rows = 32K batch elements).
    chunk_rows: packed rows per in-kernel compute chunk (256 rows = 4096
                elements -> ~2 MiB live hidden activation).
    """
    B, S = state.shape
    H = w1.shape[1]

    # Packing factor: P states per lane-dense packed row (P*S == 128 for
    # LunarLander's S=8).  Falls back to P=1 for awkward state_dim values.
    P = 128 // S if (S <= 128 and 128 % S == 0) else 1

    B_pad = _round_up(B, P)
    if B_pad != B:
        # Pads at most P-1 rows; power-of-two PPO batches take the zero-copy
        # path with no pad at all.
        state = jnp.pad(state, ((0, B_pad - B), (0, 0)))
    R = B_pad // P
    xp = state.reshape(R, P * S)      # row-major reshape: no data movement

    # Small resident block-diagonal weights (built from the raw params; ~1 MiB).
    eye_p = jnp.eye(P, dtype=jnp.float32)
    w1f = w1.astype(jnp.float32)
    w2f = w2.reshape(H).astype(jnp.float32)
    w1_bd = jnp.einsum("ij,sh->isjh", eye_p, w1f).reshape(P * S, P * H)
    w2_bd = jnp.einsum("ij,h->ihj", eye_p, w2f).reshape(P * H, P)
    b1_row = jnp.tile(b1.reshape(1, H).astype(jnp.float32), (1, P))
    b2_s = b2.reshape(1, 1).astype(jnp.float32)

    # Batch tile in packed rows: single tile only for tiny batches, otherwise
    # >= 2 grid steps (v7x has 2 TensorCores), capped at block_rows.
    block_rows = max(8, _round_up(block_rows, 8))
    if R <= 8:
        rb = R
    elif R <= block_rows:
        rb = min(_round_up(pl.cdiv(R, 2), 8), R)
    else:
        rb = block_rows
    grid = (pl.cdiv(R, rb),)

    kernel = functools.partial(_critic_kernel, chunk_rows=chunk_rows)

    out = pl.pallas_call(
        kernel,
        out_shape=jax.ShapeDtypeStruct((R, P), jnp.float32),
        grid=grid,
        in_specs=[
            pl.BlockSpec((rb, P * S), lambda i: (i, 0)),        # packed states
            pl.BlockSpec((P * S, P * H), lambda i: (0, 0)),     # W1 (resident)
            pl.BlockSpec((1, P * H), lambda i: (0, 0)),         # b1 (resident)
            pl.BlockSpec((P * H, P), lambda i: (0, 0)),         # W2 (resident)
            pl.BlockSpec(memory_space=pltpu.MemorySpace.SMEM),  # b2 scalar
        ],
        out_specs=pl.BlockSpec((rb, P), lambda i: (i, 0)),
        compiler_params=pltpu.CompilerParams(
            dimension_semantics=("parallel",),
            # ~13 MiB live at default tile sizes; 32 MiB is safe on v5e/v6e
            # (128 MiB physical) and within v7x's 64 MiB physical VMEM.
            vmem_limit_bytes=32 * 1024 * 1024,
        ),
    )(xp, w1_bd, b1_row, w2_bd, b2_s)

    # (R, P) row-major is exactly batch order: free reshape, then drop pads.
    return out.reshape(B_pad, 1)[:B]


def init_critic_params(key, state_dim, hidden=128):
    """Deterministic init mimicking PyTorch's default Linear init
    (uniform in +/- 1/sqrt(fan_in))."""
    k1, k2, k3, k4 = jax.random.split(key, 4)
    bound1 = 1.0 / jnp.sqrt(state_dim)
    bound2 = 1.0 / jnp.sqrt(hidden)
    w1 = jax.random.uniform(k1, (state_dim, hidden), jnp.float32, -bound1, bound1)
    b1 = jax.random.uniform(k2, (1, hidden), jnp.float32, -bound1, bound1)
    w2 = jax.random.uniform(k3, (hidden, 1), jnp.float32, -bound2, bound2)
    b2 = jax.random.uniform(k4, (1, 1), jnp.float32, -bound2, bound2)
    return w1, b1, w2, b2


if __name__ == "__main__":
    # LunarLander-v2 observation space is 8-dimensional.
    STATE_DIM = 8
    BATCH = 2

    key = jax.random.PRNGKey(0)
    k_params, k_state = jax.random.split(key)

    w1, b1, w2, b2 = init_critic_params(k_params, STATE_DIM)
    state = jax.random.normal(k_state, (BATCH, STATE_DIM), jnp.float32)

    def reference(x):
        return jnp.maximum(x @ w1 + b1, 0.0) @ w2 + b2

    # Tiny batch (single packed row, single grid step).
    value = jax.block_until_ready(critic_forward(state, w1, b1, w2, b2))
    assert value.shape == (BATCH, 1)
    assert jnp.allclose(value, reference(state), atol=1e-5, rtol=1e-5)

    # Larger batches: exercise the multi-step grid, the in-kernel chunk loop
    # and a batch that is not a multiple of the packing factor (3000 % 16 != 0).
    for big_b, br, cr in ((4096, 64, 16), (3000, 2048, 256)):
        sb = jax.random.normal(jax.random.PRNGKey(1), (big_b, STATE_DIM),
                               jnp.float32)
        vb = jax.block_until_ready(
            critic_forward(sb, w1, b1, w2, b2, block_rows=br, chunk_rows=cr))
        assert vb.shape == (big_b, 1)
        assert jnp.allclose(vb, reference(sb), atol=1e-4, rtol=1e-4)

    print("KERNEL_OK")
</pallas_src>

<mosaic_0001>
module attributes {stable_mosaic.version = 11 : i64} {
  func.func @_critic_kernel(%arg0: i32, %arg1: memref<1x128xf32, #tpu.memory_space<vmem>>, %arg2: memref<128x2048xf32, #tpu.memory_space<vmem>>, %arg3: memref<1x2048xf32, #tpu.memory_space<vmem>>, %arg4: memref<2048x16xf32, #tpu.memory_space<vmem>>, %arg5: memref<1x1xf32, #tpu.memory_space<smem>>, %arg6: memref<1x16xf32, #tpu.memory_space<vmem>>) attributes {dimension_semantics = [#tpu.dimension_semantics<parallel>], iteration_bounds = array<i64: 1>, scalar_prefetch = 0 : i64, scratch_operands = 0 : i64, tpu.core_type = #tpu.core_type<tc>, window_params = [{transform_indices = @transform_0, window_bounds = array<i64: 1, 128>}, {pipeline_mode = #tpu.pipeline_mode<synchronous>, transform_indices = @transform_1, window_bounds = array<i64: 128, 2048>}, {pipeline_mode = #tpu.pipeline_mode<synchronous>, transform_indices = @transform_2, window_bounds = array<i64: 1, 2048>}, {pipeline_mode = #tpu.pipeline_mode<synchronous>, transform_indices = @transform_3, window_bounds = array<i64: 2048, 16>}, {transform_indices = @transform_4, window_bounds = array<i64: 1, 1>}, {transform_indices = @transform_5, window_bounds = array<i64: 1, 16>}]} {
    %c0 = arith.constant 0 : index
    %c0_0 = arith.constant 0 : index
    %0 = vector.load %arg2[%c0, %c0_0] : memref<128x2048xf32, #tpu.memory_space<vmem>>, vector<128x2048xf32>
    %c0_1 = arith.constant 0 : index
    %c0_2 = arith.constant 0 : index
    %1 = vector.load %arg3[%c0_1, %c0_2] : memref<1x2048xf32, #tpu.memory_space<vmem>>, vector<1x2048xf32>
    %c0_3 = arith.constant 0 : index
    %c0_4 = arith.constant 0 : index
    %2 = vector.load %arg4[%c0_3, %c0_4] : memref<2048x16xf32, #tpu.memory_space<vmem>>, vector<2048x16xf32>
    %c0_5 = arith.constant 0 : index
    %c0_6 = arith.constant 0 : index
    %3 = memref.load %arg5[%c0_5, %c0_6] : memref<1x1xf32, #tpu.memory_space<smem>>
    %c0_7 = arith.constant 0 : index
    %c0_8 = arith.constant 0 : index
    %4 = vector.load %arg1[%c0_7, %c0_8] : memref<1x128xf32, #tpu.memory_space<vmem>>, vector<1x128xf32>
    %cst = arith.constant dense<0.000000e+00> : vector<1x2048xf32>
    %5 = tpu.matmul %4, %0, %cst {dimension_numbers = #tpu.dot_dimension_numbers<[1], [0], [0], [1], [0, 0, 1, 1], [], []>} : vector<1x128xf32>, vector<128x2048xf32>, vector<1x2048xf32> -> vector<1x2048xf32>
    %6 = arith.addf %5, %1 : vector<1x2048xf32>
    %cst_9 = arith.constant 0.000000e+00 : f32
    %7 = vector.broadcast %cst_9 : f32 to vector<1x2048xf32>
    %8 = arith.maximumf %6, %7 : vector<1x2048xf32>
    %cst_10 = arith.constant dense<0.000000e+00> : vector<1x16xf32>
    %9 = tpu.matmul %8, %2, %cst_10 {dimension_numbers = #tpu.dot_dimension_numbers<[1], [0], [0], [1], [0, 0, 1, 1], [], []>} : vector<1x2048xf32>, vector<2048x16xf32>, vector<1x16xf32> -> vector<1x16xf32>
    %10 = vector.broadcast %3 : f32 to vector<1x16xf32>
    %11 = arith.addf %9, %10 : vector<1x16xf32>
    %c0_11 = arith.constant 0 : index
    %c0_12 = arith.constant 0 : index
    %12 = vector.load %arg6[%c0_11, %c0_12] : memref<1x16xf32, #tpu.memory_space<vmem>>, vector<1x16xf32>
    tpu.vector_store %arg6[%c0_11, %c0_12], %11 {strides = array<i32>} : memref<1x16xf32, #tpu.memory_space<vmem>>, vector<1x16xf32>,
    return
  }
  func.func @transform_0(%arg0: i32) -> (i32, i32) {
    %c0_i32 = arith.constant 0 : i32
    %c0_i32_0 = arith.constant 0 : i32
    return %arg0, %c0_i32 : i32, i32
  }
  func.func @transform_1(%arg0: i32) -> (i32, i32) {
    %c0_i32 = arith.constant 0 : i32
    %c0_i32_0 = arith.constant 0 : i32
    %c0_i32_1 = arith.constant 0 : i32
    return %c0_i32, %c0_i32_0 : i32, i32
  }
  func.func @transform_2(%arg0: i32) -> (i32, i32) {
    %c0_i32 = arith.constant 0 : i32
    %c0_i32_0 = arith.constant 0 : i32
    %c0_i32_1 = arith.constant 0 : i32
    return %c0_i32, %c0_i32_0 : i32, i32
  }
  func.func @transform_3(%arg0: i32) -> (i32, i32) {
    %c0_i32 = arith.constant 0 : i32
    %c0_i32_0 = arith.constant 0 : i32
    %c0_i32_1 = arith.constant 0 : i32
    return %c0_i32, %c0_i32_0 : i32, i32
  }
  func.func @transform_4(%arg0: i32) -> (i32, i32) {
    %c0_i32 = arith.constant 0 : i32
    %c0_i32_0 = arith.constant 0 : i32
    %c0_i32_1 = arith.constant 0 : i32
    return %c0_i32, %c0_i32_0 : i32, i32
  }
  func.func @transform_5(%arg0: i32) -> (i32, i32) {
    %c0_i32 = arith.constant 0 : i32
    %c0_i32_0 = arith.constant 0 : i32
    return %arg0, %c0_i32 : i32, i32
  }
}

</mosaic_0001>

<bundles_post_ra>
// kernel: tpu_custom_call.1
= control target key start
LH: loop header
LB: loop body
LE: loop exit
PB: predicated region body
PF: predicated region fallthrough
CT: control target
= control target key end

     0   :  { %s3748_s0 = inlined_call_operand.vmem [shape: f32[1,128], index: 0, kind: input, shape index: {}]   ;;  %s3749_s1 = inlined_call_operand.vmem [shape: f32[128,2048], index: 1, kind: input, shape index: {}]   ;;  %s3750_s2 = inlined_call_operand.vmem [shape: f32[1,2048], index: 2, kind: input, shape index: {}]   ;;  %s3751_s3 = inlined_call_operand.vmem [shape: f32[2048,16], index: 3, kind: input, shape index: {}]   ;;  %s3752_s4 = inlined_call_operand.<no memory space> [shape: f32[1,1], index: 4, kind: input, shape index: {}]   ;;  %s3753_s5 = inlined_call_operand.hbm [shape: f32[1,16], index: 5, kind: output, shape index: {}]  }
   0x1   :  { %v263_v0 = vld [vmem:[%s3749_s1 + $0x788] sm:$0xff]  ;;  %v265_v1 = vld [vmem:[%s3749_s1 + $0x798] sm:$0xff]  ;;  %v262_v2 = vld [vmem:[%s3749_s1 + $0x780] sm:$0xff] }
   0x2   :  { %620 = vmatprep.subr.mxu0 %v263_v0  ;;  %691 = vmatprep.subr.mxu1 %v265_v1  ;;  %v264_v3 = vld [vmem:[%s3749_s1 + $0x790] sm:$0xff]  ;;  %v247_v4 = vld [vmem:[%s3749_s1 + $0x708] sm:$0xff]  ;;  %v249_v5 = vld [vmem:[%s3749_s1 + $0x718] sm:$0xff]  ;;  %v2085_v1 = vmov 0.0  }
   0x3   :  { %621 = vmatpush1.msra.mxu0 %v262_v2  ;;  %692 = vmatpush1.msra.mxu1 %v264_v3  ;;  %v246_v6 = vld [vmem:[%s3749_s1 + $0x700] sm:$0xff]  ;;  %v248_v7 = vld [vmem:[%s3749_s1 + $0x710] sm:$0xff]  ;;  %v231_v8 = vld [vmem:[%s3749_s1 + $0x688] sm:$0xff] }
   0x4   :  { %622 = vmatprep.subr.mxu0 %v247_v4  ;;  %693 = vmatprep.subr.mxu1 %v249_v5  ;;  %v233_v9 = vld [vmem:[%s3749_s1 + $0x698] sm:$0xff]  ;;  %v230_v10 = vld [vmem:[%s3749_s1 + $0x680] sm:$0xff]  ;;  %v232_v11 = vld [vmem:[%s3749_s1 + $0x690] sm:$0xff] }
   0x5   :  { %623 = vmatpush1.msra.mxu0 %v246_v6  ;;  %694 = vmatpush1.msra.mxu1 %v248_v7  ;;  %v215_v12 = vld [vmem:[%s3749_s1 + $0x608] sm:$0xff]  ;;  %v217_v13 = vld [vmem:[%s3749_s1 + $0x618] sm:$0xff]  ;;  %v214_v14 = vld [vmem:[%s3749_s1 + $0x600] sm:$0xff] }
   0x6   :  { %624 = vmatprep.subr.mxu0 %v231_v8  ;;  %695 = vmatprep.subr.mxu1 %v233_v9  ;;  %v216_v15 = vld [vmem:[%s3749_s1 + $0x610] sm:$0xff]  ;;  %v199_v16 = vld [vmem:[%s3749_s1 + $0x588] sm:$0xff]  ;;  %v201_v17 = vld [vmem:[%s3749_s1 + $0x598] sm:$0xff] }
   0x7   :  { %625 = vmatpush1.msra.mxu0 %v230_v10  ;;  %696 = vmatpush1.msra.mxu1 %v232_v11  ;;  %v198_v18 = vld [vmem:[%s3749_s1 + $0x580] sm:$0xff]  ;;  %v200_v19 = vld [vmem:[%s3749_s1 + $0x590] sm:$0xff]  ;;  %v183_v20 = vld [vmem:[%s3749_s1 + $0x508] sm:$0xff] }
   0x8   :  { %626 = vmatprep.subr.mxu0 %v215_v12  ;;  %697 = vmatprep.subr.mxu1 %v217_v13  ;;  %v185_v21 = vld [vmem:[%s3749_s1 + $0x518] sm:$0xff]  ;;  %v182_v22 = vld [vmem:[%s3749_s1 + $0x500] sm:$0xff]  ;;  %v184_v23 = vld [vmem:[%s3749_s1 + $0x510] sm:$0xff] }
   0x9   :  { %627 = vmatpush1.msra.mxu0 %v214_v14  ;;  %698 = vmatpush1.msra.mxu1 %v216_v15  ;;  %v167_v24 = vld [vmem:[%s3749_s1 + $0x488] sm:$0xff]  ;;  %v169_v25 = vld [vmem:[%s3749_s1 + $0x498] sm:$0xff]  ;;  %v166_v26 = vld [vmem:[%s3749_s1 + $0x480] sm:$0xff] }
   0xa   :  { %628 = vmatprep.subr.mxu0 %v199_v16  ;;  %699 = vmatprep.subr.mxu1 %v201_v17  ;;  %v168_v27 = vld [vmem:[%s3749_s1 + $0x490] sm:$0xff]  ;;  %v151_v28 = vld [vmem:[%s3749_s1 + $0x408] sm:$0xff]  ;;  %v153_v29 = vld [vmem:[%s3749_s1 + $0x418] sm:$0xff] }
   0xb   :  { %629 = vmatpush1.msra.mxu0 %v198_v18  ;;  %700 = vmatpush1.msra.mxu1 %v200_v19  ;;  %v150_v30 = vld [vmem:[%s3749_s1 + $0x400] sm:$0xff]  ;;  %v152_v31 = vld [vmem:[%s3749_s1 + $0x410] sm:$0xff]  ;;  %v135_v32 = vld [vmem:[%s3749_s1 + $0x388] sm:$0xff] }
   0xc   :  { %630 = vmatprep.subr.mxu0 %v183_v20  ;;  %701 = vmatprep.subr.mxu1 %v185_v21  ;;  %v137_v33 = vld [vmem:[%s3749_s1 + $0x398] sm:$0xff]  ;;  %v134_v34 = vld [vmem:[%s3749_s1 + $0x380] sm:$0xff]  ;;  %v136_v35 = vld [vmem:[%s3749_s1 + $0x390] sm:$0xff] }
   0xd   :  { %631 = vmatpush1.msra.mxu0 %v182_v22  ;;  %702 = vmatpush1.msra.mxu1 %v184_v23  ;;  %v119_v36 = vld [vmem:[%s3749_s1 + $0x308] sm:$0xff]  ;;  %v121_v37 = vld [vmem:[%s3749_s1 + $0x318] sm:$0xff]  ;;  %v118_v38 = vld [vmem:[%s3749_s1 + $0x300] sm:$0xff] }
   0xe   :  { %632 = vmatprep.subr.mxu0 %v167_v24  ;;  %703 = vmatprep.subr.mxu1 %v169_v25  ;;  %v120_v39 = vld [vmem:[%s3749_s1 + $0x310] sm:$0xff]  ;;  %v103_v40 = vld [vmem:[%s3749_s1 + $0x288] sm:$0xff]  ;;  %v105_v41 = vld [vmem:[%s3749_s1 + $0x298] sm:$0xff] }
   0xf   :  { %633 = vmatpush1.msra.mxu0 %v166_v26  ;;  %704 = vmatpush1.msra.mxu1 %v168_v27  ;;  %v102_v42 = vld [vmem:[%s3749_s1 + $0x280] sm:$0xff]  ;;  %v104_v43 = vld [vmem:[%s3749_s1 + $0x290] sm:$0xff]  ;;  %v87_v44 = vld [vmem:[%s3749_s1 + $0x208] sm:$0xff] }
  0x10   :  { %634 = vmatprep.subr.mxu0 %v151_v28  ;;  %705 = vmatprep.subr.mxu1 %v153_v29  ;;  %v89_v45 = vld [vmem:[%s3749_s1 + $0x218] sm:$0xff]  ;;  %v86_v46 = vld [vmem:[%s3749_s1 + $0x200] sm:$0xff]  ;;  %v88_v47 = vld [vmem:[%s3749_s1 + $0x210] sm:$0xff] }
  0x11   :  { %635 = vmatpush1.msra.mxu0 %v150_v30  ;;  %706 = vmatpush1.msra.mxu1 %v152_v31  ;;  %v71_v48 = vld [vmem:[%s3749_s1 + $0x188] sm:$0xff]  ;;  %v73_v49 = vld [vmem:[%s3749_s1 + $0x198] sm:$0xff]  ;;  %v70_v50 = vld [vmem:[%s3749_s1 + $0x180] sm:$0xff] }
  0x12   :  { %636 = vmatprep.subr.mxu0 %v135_v32  ;;  %707 = vmatprep.subr.mxu1 %v137_v33  ;;  %v72_v51 = vld [vmem:[%s3749_s1 + $0x190] sm:$0xff]  ;;  %v55_v52 = vld [vmem:[%s3749_s1 + $0x108] sm:$0xff]  ;;  %v57_v53 = vld [vmem:[%s3749_s1 + $0x118] sm:$0xff] }
  0x13   :  { %637 = vmatpush1.msra.mxu0 %v134_v34  ;;  %708 = vmatpush1.msra.mxu1 %v136_v35  ;;  %v54_v54 = vld [vmem:[%s3749_s1 + $0x100] sm:$0xff]  ;;  %v56_v55 = vld [vmem:[%s3749_s1 + $0x110] sm:$0xff]  ;;  %v39_v56 = vld [vmem:[%s3749_s1 + $0x88] sm:$0xff] }
  0x14   :  { %638 = vmatprep.subr.mxu0 %v119_v36  ;;  %709 = vmatprep.subr.mxu1 %v121_v37  ;;  %v41_v57 = vld [vmem:[%s3749_s1 + $0x98] sm:$0xff]  ;;  %v38_v58 = vld [vmem:[%s3749_s1 + $0x80] sm:$0xff]  ;;  %v40_v59 = vld [vmem:[%s3749_s1 + $0x90] sm:$0xff] }
  0x15   :  { %639 = vmatpush1.msra.mxu0 %v118_v38  ;;  %710 = vmatpush1.msra.mxu1 %v120_v39  ;;  %v23_v60 = vld [vmem:[%s3749_s1 + $0x8] sm:$0xff]  ;;  %v25_v61 = vld [vmem:[%s3749_s1 + $0x18] sm:$0xff]  ;;  %v22_v62 = vld [vmem:[%s3749_s1] sm:$0xff] }
  0x16   :  { %640 = vmatprep.subr.mxu0 %v103_v40  ;;  %711 = vmatprep.subr.mxu1 %v105_v41  ;;  %v24_v63 = vld [vmem:[%s3749_s1 + $0x10] sm:$0xff]  ;;  %v2312_v0 = vld [vmem:[%s3748_s0] sm:$0x1]  ;;  %v267_v2 = vld [vmem:[%s3749_s1 + $0x7a8] sm:$0xff] }
  0x17   :  { %641 = vmatpush1.msra.mxu0 %v102_v42  ;;  %712 = vmatpush1.msra.mxu1 %v104_v43  ;;  %v269_v3 = vld [vmem:[%s3749_s1 + $0x7b8] sm:$0xff]  ;;  %v266_v4 = vld [vmem:[%s3749_s1 + $0x7a0] sm:$0xff]  ;;  %v268_v5 = vld [vmem:[%s3749_s1 + $0x7b0] sm:$0xff] }
  0x18   :  { %642 = vmatprep.subr.mxu0 %v87_v44  ;;  %713 = vmatprep.subr.mxu1 %v89_v45  ;;  %v251_v6 = vld [vmem:[%s3749_s1 + $0x728] sm:$0xff]  ;;  %v253_v7 = vld [vmem:[%s3749_s1 + $0x738] sm:$0xff]  ;;  %v250_v8 = vld [vmem:[%s3749_s1 + $0x720] sm:$0xff] }
  0x19   :  { %643 = vmatpush1.msra.mxu0 %v86_v46  ;;  %714 = vmatpush1.msra.mxu1 %v88_v47  ;;  %v252_v9 = vld [vmem:[%s3749_s1 + $0x730] sm:$0xff]  ;;  %v235_v10 = vld [vmem:[%s3749_s1 + $0x6a8] sm:$0xff]  ;;  %v237_v11 = vld [vmem:[%s3749_s1 + $0x6b8] sm:$0xff] }
  0x1a   :  { %644 = vmatprep.subr.mxu0 %v71_v48  ;;  %715 = vmatprep.subr.mxu1 %v73_v49  ;;  %v234_v12 = vld [vmem:[%s3749_s1 + $0x6a0] sm:$0xff]  ;;  %v236_v13 = vld [vmem:[%s3749_s1 + $0x6b0] sm:$0xff]  ;;  %v219_v14 = vld [vmem:[%s3749_s1 + $0x628] sm:$0xff] }
  0x1b   :  { %645 = vmatpush1.msra.mxu0 %v70_v50  ;;  %716 = vmatpush1.msra.mxu1 %v72_v51  ;;  %v221_v15 = vld [vmem:[%s3749_s1 + $0x638] sm:$0xff]  ;;  %v218_v16 = vld [vmem:[%s3749_s1 + $0x620] sm:$0xff]  ;;  %v220_v17 = vld [vmem:[%s3749_s1 + $0x630] sm:$0xff] }
  0x1c   :  { %646 = vmatprep.subr.mxu0 %v55_v52  ;;  %717 = vmatprep.subr.mxu1 %v57_v53  ;;  %v203_v18 = vld [vmem:[%s3749_s1 + $0x5a8] sm:$0xff]  ;;  %v205_v19 = vld [vmem:[%s3749_s1 + $0x5b8] sm:$0xff]  ;;  %v202_v20 = vld [vmem:[%s3749_s1 + $0x5a0] sm:$0xff] }
  0x1d   :  { %647 = vmatpush1.msra.mxu0 %v54_v54  ;;  %718 = vmatpush1.msra.mxu1 %v56_v55  ;;  %v204_v21 = vld [vmem:[%s3749_s1 + $0x5b0] sm:$0xff]  ;;  %v187_v22 = vld [vmem:[%s3749_s1 + $0x528] sm:$0xff]  ;;  %v189_v23 = vld [vmem:[%s3749_s1 + $0x538] sm:$0xff] }
  0x1e   :  { %648 = vmatprep.subr.mxu0 %v39_v56  ;;  %719 = vmatprep.subr.mxu1 %v41_v57  ;;  %v186_v24 = vld [vmem:[%s3749_s1 + $0x520] sm:$0xff]  ;;  %v188_v25 = vld [vmem:[%s3749_s1 + $0x530] sm:$0xff]  ;;  %v171_v26 = vld [vmem:[%s3749_s1 + $0x4a8] sm:$0xff] }
  0x1f   :  { %649 = vmatpush1.msra.mxu0 %v38_v58  ;;  %720 = vmatpush1.msra.mxu1 %v40_v59  ;;  %v173_v27 = vld [vmem:[%s3749_s1 + $0x4b8] sm:$0xff]  ;;  %v170_v28 = vld [vmem:[%s3749_s1 + $0x4a0] sm:$0xff]  ;;  %v172_v29 = vld [vmem:[%s3749_s1 + $0x4b0] sm:$0xff] }
  0x20   :  { %650 = vmatprep.subr.mxu0 %v23_v60  ;;  %721 = vmatprep.subr.mxu1 %v25_v61  ;;  %v155_v30 = vld [vmem:[%s3749_s1 + $0x428] sm:$0xff]  ;;  %v157_v31 = vld [vmem:[%s3749_s1 + $0x438] sm:$0xff]  ;;  %v154_v32 = vld [vmem:[%s3749_s1 + $0x420] sm:$0xff] }
  0x21   :  { %651 = vmatpush1.msra.mxu0 %v22_v62  ;;  %684 = vmatprep.mubr.f32.mxu0 %v2085_v1  ;;  %v156_v33 = vld [vmem:[%s3749_s1 + $0x430] sm:$0xff]  ;;  %v139_v34 = vld [vmem:[%s3749_s1 + $0x3a8] sm:$0xff]  ;;  %v141_v35 = vld [vmem:[%s3749_s1 + $0x3b8] sm:$0xff] }
  0x22   :  { %722 = vmatpush1.msra.mxu1 %v24_v63  ;;  %755 = vmatprep.mubr.f32.mxu1 %v2085_v1  ;;  %v138_v36 = vld [vmem:[%s3749_s1 + $0x3a0] sm:$0xff]  ;;  %v140_v37 = vld [vmem:[%s3749_s1 + $0x3b0] sm:$0xff]  ;;  %v123_v38 = vld [vmem:[%s3749_s1 + $0x328] sm:$0xff] }
  0x23   :  { %685 = vmatmul.mubr.f32.vlgmr.msra.gmra.mxu0 %v2312_v0  ;;  %756 = vmatmul.mubr.f32.vlgmr.msra.gmra.mxu1 %v2312_v0  ;;  %v125_v39 = vld [vmem:[%s3749_s1 + $0x338] sm:$0xff]  ;;  %v122_v40 = vld [vmem:[%s3749_s1 + $0x320] sm:$0xff]  ;;  %v124_v41 = vld [vmem:[%s3749_s1 + $0x330] sm:$0xff] }
  0x24   :  { %762 = vmatprep.subr.mxu0 %v267_v2  ;;  %833 = vmatprep.subr.mxu1 %v269_v3  ;;  %v107_v42 = vld [vmem:[%s3749_s1 + $0x2a8] sm:$0xff]  ;;  %v109_v43 = vld [vmem:[%s3749_s1 + $0x2b8] sm:$0xff]  ;;  %v106_v44 = vld [vmem:[%s3749_s1 + $0x2a0] sm:$0xff] }
  0x25   :  { %763 = vmatpush1.msra.mxu0 %v266_v4  ;;  %834 = vmatpush1.msra.mxu1 %v268_v5  ;;  %v108_v45 = vld [vmem:[%s3749_s1 + $0x2b0] sm:$0xff]  ;;  %v91_v46 = vld [vmem:[%s3749_s1 + $0x228] sm:$0xff]  ;;  %v93_v47 = vld [vmem:[%s3749_s1 + $0x238] sm:$0xff] }
  0x26   :  { %764 = vmatprep.subr.mxu0 %v251_v6  ;;  %835 = vmatprep.subr.mxu1 %v253_v7  ;;  %v90_v48 = vld [vmem:[%s3749_s1 + $0x220] sm:$0xff]  ;;  %v92_v49 = vld [vmem:[%s3749_s1 + $0x230] sm:$0xff]  ;;  %v75_v50 = vld [vmem:[%s3749_s1 + $0x1a8] sm:$0xff] }
  0x27   :  { %765 = vmatpush1.msra.mxu0 %v250_v8  ;;  %836 = vmatpush1.msra.mxu1 %v252_v9  ;;  %v77_v51 = vld [vmem:[%s3749_s1 + $0x1b8] sm:$0xff]  ;;  %v74_v52 = vld [vmem:[%s3749_s1 + $0x1a0] sm:$0xff]  ;;  %v76_v53 = vld [vmem:[%s3749_s1 + $0x1b0] sm:$0xff] }
  0x28   :  { %766 = vmatprep.subr.mxu0 %v235_v10  ;;  %837 = vmatprep.subr.mxu1 %v237_v11  ;;  %v59_v54 = vld [vmem:[%s3749_s1 + $0x128] sm:$0xff]  ;;  %v61_v55 = vld [vmem:[%s3749_s1 + $0x138] sm:$0xff]  ;;  %v58_v56 = vld [vmem:[%s3749_s1 + $0x120] sm:$0xff] }
  0x29   :  { %767 = vmatpush1.msra.mxu0 %v234_v12  ;;  %838 = vmatpush1.msra.mxu1 %v236_v13  ;;  %v60_v57 = vld [vmem:[%s3749_s1 + $0x130] sm:$0xff]  ;;  %v43_v58 = vld [vmem:[%s3749_s1 + $0xa8] sm:$0xff]  ;;  %v45_v59 = vld [vmem:[%s3749_s1 + $0xb8] sm:$0xff] }
  0x2a   :  { %768 = vmatprep.subr.mxu0 %v219_v14  ;;  %839 = vmatprep.subr.mxu1 %v221_v15  ;;  %v42_v60 = vld [vmem:[%s3749_s1 + $0xa0] sm:$0xff]  ;;  %v44_v61 = vld [vmem:[%s3749_s1 + $0xb0] sm:$0xff]  ;;  %v27_v62 = vld [vmem:[%s3749_s1 + $0x28] sm:$0xff] }
  0x2b   :  { %769 = vmatpush1.msra.mxu0 %v218_v16  ;;  %840 = vmatpush1.msra.mxu1 %v220_v17  ;;  %v29_v63 = vld [vmem:[%s3749_s1 + $0x38] sm:$0xff]  ;;  %v26_v2 = vld [vmem:[%s3749_s1 + $0x20] sm:$0xff]  ;;  %v28_v3 = vld [vmem:[%s3749_s1 + $0x30] sm:$0xff] }
  0x2c   :  { %770 = vmatprep.subr.mxu0 %v203_v18  ;;  %841 = vmatprep.subr.mxu1 %v205_v19  ;;  %v271_v4 = vld [vmem:[%s3749_s1 + $0x7c8] sm:$0xff]  ;;  %v273_v5 = vld [vmem:[%s3749_s1 + $0x7d8] sm:$0xff]  ;;  %v270_v6 = vld [vmem:[%s3749_s1 + $0x7c0] sm:$0xff] }
  0x2d   :  { %771 = vmatpush1.msra.mxu0 %v202_v20  ;;  %842 = vmatpush1.msra.mxu1 %v204_v21  ;;  %v272_v7 = vld [vmem:[%s3749_s1 + $0x7d0] sm:$0xff]  ;;  %v255_v8 = vld [vmem:[%s3749_s1 + $0x748] sm:$0xff]  ;;  %v257_v9 = vld [vmem:[%s3749_s1 + $0x758] sm:$0xff] }
  0x2e   :  { %772 = vmatprep.subr.mxu0 %v187_v22  ;;  %843 = vmatprep.subr.mxu1 %v189_v23  ;;  %v254_v10 = vld [vmem:[%s3749_s1 + $0x740] sm:$0xff]  ;;  %v256_v11 = vld [vmem:[%s3749_s1 + $0x750] sm:$0xff]  ;;  %v239_v12 = vld [vmem:[%s3749_s1 + $0x6c8] sm:$0xff] }
  0x2f   :  { %773 = vmatpush1.msra.mxu0 %v186_v24  ;;  %844 = vmatpush1.msra.mxu1 %v188_v25  ;;  %v241_v13 = vld [vmem:[%s3749_s1 + $0x6d8] sm:$0xff]  ;;  %v238_v14 = vld [vmem:[%s3749_s1 + $0x6c0] sm:$0xff]  ;;  %v240_v15 = vld [vmem:[%s3749_s1 + $0x6d0] sm:$0xff] }
  0x30   :  { %774 = vmatprep.subr.mxu0 %v171_v26  ;;  %845 = vmatprep.subr.mxu1 %v173_v27  ;;  %v223_v16 = vld [vmem:[%s3749_s1 + $0x648] sm:$0xff]  ;;  %v225_v17 = vld [vmem:[%s3749_s1 + $0x658] sm:$0xff]  ;;  %v222_v18 = vld [vmem:[%s3749_s1 + $0x640] sm:$0xff] }
  0x31   :  { %775 = vmatpush1.msra.mxu0 %v170_v28  ;;  %846 = vmatpush1.msra.mxu1 %v172_v29  ;;  %v224_v19 = vld [vmem:[%s3749_s1 + $0x650] sm:$0xff]  ;;  %v207_v20 = vld [vmem:[%s3749_s1 + $0x5c8] sm:$0xff]  ;;  %v209_v21 = vld [vmem:[%s3749_s1 + $0x5d8] sm:$0xff] }
  0x32   :  { %776 = vmatprep.subr.mxu0 %v155_v30  ;;  %847 = vmatprep.subr.mxu1 %v157_v31  ;;  %v206_v22 = vld [vmem:[%s3749_s1 + $0x5c0] sm:$0xff]  ;;  %v208_v23 = vld [vmem:[%s3749_s1 + $0x5d0] sm:$0xff]  ;;  %v191_v24 = vld [vmem:[%s3749_s1 + $0x548] sm:$0xff] }
  0x33   :  { %777 = vmatpush1.msra.mxu0 %v154_v32  ;;  %848 = vmatpush1.msra.mxu1 %v156_v33  ;;  %v193_v25 = vld [vmem:[%s3749_s1 + $0x558] sm:$0xff]  ;;  %v190_v26 = vld [vmem:[%s3749_s1 + $0x540] sm:$0xff]  ;;  %v192_v27 = vld [vmem:[%s3749_s1 + $0x550] sm:$0xff] }
  0x34   :  { %778 = vmatprep.subr.mxu0 %v139_v34  ;;  %849 = vmatprep.subr.mxu1 %v141_v35  ;;  %v175_v28 = vld [vmem:[%s3749_s1 + $0x4c8] sm:$0xff]  ;;  %v177_v29 = vld [vmem:[%s3749_s1 + $0x4d8] sm:$0xff]  ;;  %v174_v30 = vld [vmem:[%s3749_s1 + $0x4c0] sm:$0xff] }
  0x35   :  { %779 = vmatpush1.msra.mxu0 %v138_v36  ;;  %850 = vmatpush1.msra.mxu1 %v140_v37  ;;  %v176_v31 = vld [vmem:[%s3749_s1 + $0x4d0] sm:$0xff]  ;;  %v159_v32 = vld [vmem:[%s3749_s1 + $0x448] sm:$0xff]  ;;  %v161_v33 = vld [vmem:[%s3749_s1 + $0x458] sm:$0xff] }
  0x36   :  { %780 = vmatprep.subr.mxu0 %v123_v38  ;;  %851 = vmatprep.subr.mxu1 %v125_v39  ;;  %v158_v34 = vld [vmem:[%s3749_s1 + $0x440] sm:$0xff]  ;;  %v160_v35 = vld [vmem:[%s3749_s1 + $0x450] sm:$0xff]  ;;  %v143_v36 = vld [vmem:[%s3749_s1 + $0x3c8] sm:$0xff] }
  0x37   :  { %781 = vmatpush1.msra.mxu0 %v122_v40  ;;  %852 = vmatpush1.msra.mxu1 %v124_v41  ;;  %v145_v37 = vld [vmem:[%s3749_s1 + $0x3d8] sm:$0xff]  ;;  %v142_v38 = vld [vmem:[%s3749_s1 + $0x3c0] sm:$0xff]  ;;  %v144_v39 = vld [vmem:[%s3749_s1 + $0x3d0] sm:$0xff] }
  0x38   :  { %782 = vmatprep.subr.mxu0 %v107_v42  ;;  %853 = vmatprep.subr.mxu1 %v109_v43  ;;  %v127_v40 = vld [vmem:[%s3749_s1 + $0x348] sm:$0xff]  ;;  %v129_v41 = vld [vmem:[%s3749_s1 + $0x358] sm:$0xff]  ;;  %v126_v42 = vld [vmem:[%s3749_s1 + $0x340] sm:$0xff] }
  0x39   :  { %783 = vmatpush1.msra.mxu0 %v106_v44  ;;  %854 = vmatpush1.msra.mxu1 %v108_v45  ;;  %v128_v43 = vld [vmem:[%s3749_s1 + $0x350] sm:$0xff]  ;;  %v111_v44 = vld [vmem:[%s3749_s1 + $0x2c8] sm:$0xff]  ;;  %v113_v45 = vld [vmem:[%s3749_s1 + $0x2d8] sm:$0xff] }
  0x3a   :  { %784 = vmatprep.subr.mxu0 %v91_v46  ;;  %855 = vmatprep.subr.mxu1 %v93_v47  ;;  %v110_v46 = vld [vmem:[%s3749_s1 + $0x2c0] sm:$0xff]  ;;  %v112_v47 = vld [vmem:[%s3749_s1 + $0x2d0] sm:$0xff] }
  0x3b   :  { %785 = vmatpush1.msra.mxu0 %v90_v48  ;;  %856 = vmatpush1.msra.mxu1 %v92_v49  ;;  %v95_v48 = vld [vmem:[%s3749_s1 + $0x248] sm:$0xff]  ;;  %v97_v49 = vld [vmem:[%s3749_s1 + $0x258] sm:$0xff] }
  0x3c   :  { %786 = vmatprep.subr.mxu0 %v75_v50  ;;  %857 = vmatprep.subr.mxu1 %v77_v51  ;;  %v94_v50 = vld [vmem:[%s3749_s1 + $0x240] sm:$0xff]  ;;  %v96_v51 = vld [vmem:[%s3749_s1 + $0x250] sm:$0xff] }
  0x3d   :  { %787 = vmatpush1.msra.mxu0 %v74_v52  ;;  %858 = vmatpush1.msra.mxu1 %v76_v53  ;;  %v79_v52 = vld [vmem:[%s3749_s1 + $0x1c8] sm:$0xff]  ;;  %v81_v53 = vld [vmem:[%s3749_s1 + $0x1d8] sm:$0xff] }
  0x3e   :  { %788 = vmatprep.subr.mxu0 %v59_v54  ;;  %859 = vmatprep.subr.mxu1 %v61_v55  ;;  %v78_v54 = vld [vmem:[%s3749_s1 + $0x1c0] sm:$0xff]  ;;  %v80_v55 = vld [vmem:[%s3749_s1 + $0x1d0] sm:$0xff] }
  0x3f   :  { %789 = vmatpush1.msra.mxu0 %v58_v56  ;;  %860 = vmatpush1.msra.mxu1 %v60_v57  ;;  %v63_v56 = vld [vmem:[%s3749_s1 + $0x148] sm:$0xff]  ;;  %v65_v57 = vld [vmem:[%s3749_s1 + $0x158] sm:$0xff] }
  0x40   :  { %790 = vmatprep.subr.mxu0 %v43_v58  ;;  %861 = vmatprep.subr.mxu1 %v45_v59  ;;  %v62_v58 = vld [vmem:[%s3749_s1 + $0x140] sm:$0xff]  ;;  %v64_v59 = vld [vmem:[%s3749_s1 + $0x150] sm:$0xff] }
  0x41   :  { %791 = vmatpush1.msra.mxu0 %v42_v60  ;;  %862 = vmatpush1.msra.mxu1 %v44_v61  ;;  %v47_v60 = vld [vmem:[%s3749_s1 + $0xc8] sm:$0xff]  ;;  %v49_v61 = vld [vmem:[%s3749_s1 + $0xd8] sm:$0xff] }
  0x42   :  { %792 = vmatprep.subr.mxu0 %v27_v62  ;;  %863 = vmatprep.subr.mxu1 %v29_v63  ;;  %v46_v62 = vld [vmem:[%s3749_s1 + $0xc0] sm:$0xff]  ;;  %v48_v63 = vld [vmem:[%s3749_s1 + $0xd0] sm:$0xff] }
  0x43   :  { %793 = vmatpush1.msra.mxu0 %v26_v2  ;;  %826 = vmatprep.mubr.f32.mxu0 %v2085_v1  ;;  %v31_v2 = vld [vmem:[%s3749_s1 + $0x48] sm:$0xff] }
  0x44   :  { %864 = vmatpush1.msra.mxu1 %v28_v3  ;;  %897 = vmatprep.mubr.f32.mxu1 %v2085_v1  ;;  %v33_v3 = vld [vmem:[%s3749_s1 + $0x58] sm:$0xff] }
  0x45   :  { %827 = vmatmul.mubr.f32.vlgmr.msra.gmra.mxu0 %v2312_v0  ;;  %898 = vmatmul.mubr.f32.vlgmr.msra.gmra.mxu1 %v2312_v0 }
  0x46   :  { %904 = vmatprep.subr.mxu0 %v271_v4  ;;  %975 = vmatprep.subr.mxu1 %v273_v5  ;;  %v30_v4 = vld [vmem:[%s3749_s1 + $0x40] sm:$0xff]  ;;  %v32_v5 = vld [vmem:[%s3749_s1 + $0x50] sm:$0xff] }
  0x47   :  { %905 = vmatpush1.msra.mxu0 %v270_v6  ;;  %976 = vmatpush1.msra.mxu1 %v272_v7  ;;  %v275_v6 = vld [vmem:[%s3749_s1 + $0x7e8] sm:$0xff]  ;;  %v277_v7 = vld [vmem:[%s3749_s1 + $0x7f8] sm:$0xff] }
  0x48   :  { %906 = vmatprep.subr.mxu0 %v255_v8  ;;  %977 = vmatprep.subr.mxu1 %v257_v9  ;;  %v274_v8 = vld [vmem:[%s3749_s1 + $0x7e0] sm:$0xff]  ;;  %v276_v9 = vld [vmem:[%s3749_s1 + $0x7f0] sm:$0xff] }
  0x49   :  { %907 = vmatpush1.msra.mxu0 %v254_v10  ;;  %978 = vmatpush1.msra.mxu1 %v256_v11  ;;  %v259_v10 = vld [vmem:[%s3749_s1 + $0x768] sm:$0xff]  ;;  %v261_v11 = vld [vmem:[%s3749_s1 + $0x778] sm:$0xff] }
  0x4a   :  { %908 = vmatprep.subr.mxu0 %v239_v12  ;;  %979 = vmatprep.subr.mxu1 %v241_v13  ;;  %v258_v12 = vld [vmem:[%s3749_s1 + $0x760] sm:$0xff]  ;;  %v260_v13 = vld [vmem:[%s3749_s1 + $0x770] sm:$0xff] }
  0x4b   :  { %909 = vmatpush1.msra.mxu0 %v238_v14  ;;  %980 = vmatpush1.msra.mxu1 %v240_v15  ;;  %v243_v14 = vld [vmem:[%s3749_s1 + $0x6e8] sm:$0xff]  ;;  %v245_v15 = vld [vmem:[%s3749_s1 + $0x6f8] sm:$0xff] }
  0x4c   :  { %910 = vmatprep.subr.mxu0 %v223_v16  ;;  %981 = vmatprep.subr.mxu1 %v225_v17  ;;  %v242_v16 = vld [vmem:[%s3749_s1 + $0x6e0] sm:$0xff]  ;;  %v244_v17 = vld [vmem:[%s3749_s1 + $0x6f0] sm:$0xff] }
  0x4d   :  { %911 = vmatpush1.msra.mxu0 %v222_v18  ;;  %982 = vmatpush1.msra.mxu1 %v224_v19  ;;  %v227_v18 = vld [vmem:[%s3749_s1 + $0x668] sm:$0xff]  ;;  %v229_v19 = vld [vmem:[%s3749_s1 + $0x678] sm:$0xff] }
  0x4e   :  { %912 = vmatprep.subr.mxu0 %v207_v20  ;;  %983 = vmatprep.subr.mxu1 %v209_v21  ;;  %v226_v20 = vld [vmem:[%s3749_s1 + $0x660] sm:$0xff]  ;;  %v228_v21 = vld [vmem:[%s3749_s1 + $0x670] sm:$0xff] }
  0x4f   :  { %913 = vmatpush1.msra.mxu0 %v206_v22  ;;  %984 = vmatpush1.msra.mxu1 %v208_v23  ;;  %v211_v22 = vld [vmem:[%s3749_s1 + $0x5e8] sm:$0xff]  ;;  %v213_v23 = vld [vmem:[%s3749_s1 + $0x5f8] sm:$0xff] }
  0x50   :  { %914 = vmatprep.subr.mxu0 %v191_v24  ;;  %985 = vmatprep.subr.mxu1 %v193_v25  ;;  %v210_v24 = vld [vmem:[%s3749_s1 + $0x5e0] sm:$0xff]  ;;  %v212_v25 = vld [vmem:[%s3749_s1 + $0x5f0] sm:$0xff] }
  0x51   :  { %915 = vmatpush1.msra.mxu0 %v190_v26  ;;  %986 = vmatpush1.msra.mxu1 %v192_v27  ;;  %v195_v26 = vld [vmem:[%s3749_s1 + $0x568] sm:$0xff]  ;;  %v197_v27 = vld [vmem:[%s3749_s1 + $0x578] sm:$0xff] }
  0x52   :  { %916 = vmatprep.subr.mxu0 %v175_v28  ;;  %987 = vmatprep.subr.mxu1 %v177_v29  ;;  %v194_v28 = vld [vmem:[%s3749_s1 + $0x560] sm:$0xff]  ;;  %v196_v29 = vld [vmem:[%s3749_s1 + $0x570] sm:$0xff] }
  0x53   :  { %917 = vmatpush1.msra.mxu0 %v174_v30  ;;  %988 = vmatpush1.msra.mxu1 %v176_v31 }
  0x54   :  { %918 = vmatprep.subr.mxu0 %v159_v32  ;;  %989 = vmatprep.subr.mxu1 %v161_v33 }
  0x55   :  { %919 = vmatpush1.msra.mxu0 %v158_v34  ;;  %990 = vmatpush1.msra.mxu1 %v160_v35 }
  0x56   :  { %920 = vmatprep.subr.mxu0 %v143_v36  ;;  %991 = vmatprep.subr.mxu1 %v145_v37 }
  0x57   :  { %921 = vmatpush1.msra.mxu0 %v142_v38  ;;  %992 = vmatpush1.msra.mxu1 %v144_v39 }
  0x58   :  { %922 = vmatprep.subr.mxu0 %v127_v40  ;;  %993 = vmatprep.subr.mxu1 %v129_v41 }
  0x59   :  { %923 = vmatpush1.msra.mxu0 %v126_v42  ;;  %994 = vmatpush1.msra.mxu1 %v128_v43 }
  0x5a   :  { %924 = vmatprep.subr.mxu0 %v111_v44  ;;  %995 = vmatprep.subr.mxu1 %v113_v45 }
  0x5b   :  { %925 = vmatpush1.msra.mxu0 %v110_v46  ;;  %996 = vmatpush1.msra.mxu1 %v112_v47 }
  0x5c   :  { %926 = vmatprep.subr.mxu0 %v95_v48  ;;  %997 = vmatprep.subr.mxu1 %v97_v49 }
  0x5d   :  { %927 = vmatpush1.msra.mxu0 %v94_v50  ;;  %998 = vmatpush1.msra.mxu1 %v96_v51 }
  0x5e   :  { %928 = vmatprep.subr.mxu0 %v79_v52  ;;  %999 = vmatprep.subr.mxu1 %v81_v53 }
  0x5f   :  { %929 = vmatpush1.msra.mxu0 %v78_v54  ;;  %1000 = vmatpush1.msra.mxu1 %v80_v55 }
  0x60   :  { %930 = vmatprep.subr.mxu0 %v63_v56  ;;  %1001 = vmatprep.subr.mxu1 %v65_v57 }
  0x61   :  { %931 = vmatpush1.msra.mxu0 %v62_v58  ;;  %1002 = vmatpush1.msra.mxu1 %v64_v59 }
  0x62   :  { %932 = vmatprep.subr.mxu0 %v47_v60  ;;  %1003 = vmatprep.subr.mxu1 %v49_v61 }
  0x63   :  { %933 = vmatpush1.msra.mxu0 %v46_v62  ;;  %1004 = vmatpush1.msra.mxu1 %v48_v63 }
  0x64   :  { %934 = vmatprep.subr.mxu0 %v31_v2  ;;  %1005 = vmatprep.subr.mxu1 %v33_v3 }
  0x65   :  { %935 = vmatpush1.msra.mxu0 %v30_v4  ;;  %968 = vmatprep.mubr.f32.mxu0 %v2085_v1 }
  0x66   :  { %1006 = vmatpush1.msra.mxu1 %v32_v5  ;;  %1039 = vmatprep.mubr.f32.mxu1 %v2085_v1 }
  0x67   :  { %969 = vmatmul.mubr.f32.vlgmr.msra.gmra.mxu0 %v2312_v0  ;;  %1040 = vmatmul.mubr.f32.vlgmr.msra.gmra.mxu1 %v2312_v0 }
  0x68   :  { %1046 = vmatprep.subr.mxu0 %v275_v6  ;;  %1117 = vmatprep.subr.mxu1 %v277_v7 }
  0x69   :  { %1047 = vmatpush1.msra.mxu0 %v274_v8  ;;  %1118 = vmatpush1.msra.mxu1 %v276_v9 }
  0x6a   :  { %1048 = vmatprep.subr.mxu0 %v259_v10  ;;  %1119 = vmatprep.subr.mxu1 %v261_v11 }
  0x6b   :  { %1049 = vmatpush1.msra.mxu0 %v258_v12  ;;  %1120 = vmatpush1.msra.mxu1 %v260_v13 }
  0x6c   :  { %1050 = vmatprep.subr.mxu0 %v243_v14  ;;  %1121 = vmatprep.subr.mxu1 %v245_v15 }
  0x6d   :  { %1051 = vmatpush1.msra.mxu0 %v242_v16  ;;  %1122 = vmatpush1.msra.mxu1 %v244_v17 }
  0x6e   :  { %1052 = vmatprep.subr.mxu0 %v227_v18  ;;  %1123 = vmatprep.subr.mxu1 %v229_v19 }
  0x6f   :  { %1053 = vmatpush1.msra.mxu0 %v226_v20  ;;  %1124 = vmatpush1.msra.mxu1 %v228_v21 }
  0x70   :  { %1054 = vmatprep.subr.mxu0 %v211_v22  ;;  %1125 = vmatprep.subr.mxu1 %v213_v23 }
  0x71   :  { %11 = vsyncpa [#allocation4], 0  ;;  %1055 = vmatpush1.msra.mxu0 %v210_v24  ;;  %1126 = vmatpush1.msra.mxu1 %v212_v25  ;;  %v179_v30 = vld [vmem:[%s3749_s1 + $0x4e8] sm:$0xff]  ;;  %v181_v31 = vld [vmem:[%s3749_s1 + $0x4f8] sm:$0xff]  ;;  %vm1765_vm0 = vcmask 122880  }
  0x72   :  { %1056 = vmatprep.subr.mxu0 %v195_v26  ;;  %1127 = vmatprep.subr.mxu1 %v197_v27  ;;  %v178_v32 = vld [vmem:[%s3749_s1 + $0x4e0] sm:$0xff]  ;;  %v180_v33 = vld [vmem:[%s3749_s1 + $0x4f0] sm:$0xff]  ;;  %v163_v34 = vld [vmem:[%s3749_s1 + $0x468] sm:$0xff] }
  0x73   :  { %1057 = vmatpush1.msra.mxu0 %v194_v28  ;;  %1128 = vmatpush1.msra.mxu1 %v196_v29  ;;  %v165_v35 = vld [vmem:[%s3749_s1 + $0x478] sm:$0xff]  ;;  %v162_v36 = vld [vmem:[%s3749_s1 + $0x460] sm:$0xff]  ;;  %v164_v37 = vld [vmem:[%s3749_s1 + $0x470] sm:$0xff] }
  0x74   :  { %1058 = vmatprep.subr.mxu0 %v179_v30  ;;  %1129 = vmatprep.subr.mxu1 %v181_v31  ;;  %v147_v38 = vld [vmem:[%s3749_s1 + $0x3e8] sm:$0xff]  ;;  %v149_v39 = vld [vmem:[%s3749_s1 + $0x3f8] sm:$0xff]  ;;  %v146_v40 = vld [vmem:[%s3749_s1 + $0x3e0] sm:$0xff] }
  0x75   :  { %1059 = vmatpush1.msra.mxu0 %v178_v32  ;;  %1130 = vmatpush1.msra.mxu1 %v180_v33  ;;  %v148_v41 = vld [vmem:[%s3749_s1 + $0x3f0] sm:$0xff]  ;;  %v131_v42 = vld [vmem:[%s3749_s1 + $0x368] sm:$0xff]  ;;  %v133_v43 = vld [vmem:[%s3749_s1 + $0x378] sm:$0xff] }
  0x76   :  { %1060 = vmatprep.subr.mxu0 %v163_v34  ;;  %1131 = vmatprep.subr.mxu1 %v165_v35  ;;  %v130_v44 = vld [vmem:[%s3749_s1 + $0x360] sm:$0xff]  ;;  %v132_v45 = vld [vmem:[%s3749_s1 + $0x370] sm:$0xff]  ;;  %v115_v46 = vld [vmem:[%s3749_s1 + $0x2e8] sm:$0xff] }
  0x77   :  { %1061 = vmatpush1.msra.mxu0 %v162_v36  ;;  %1132 = vmatpush1.msra.mxu1 %v164_v37  ;;  %v117_v47 = vld [vmem:[%s3749_s1 + $0x2f8] sm:$0xff]  ;;  %v114_v48 = vld [vmem:[%s3749_s1 + $0x2e0] sm:$0xff]  ;;  %v116_v49 = vld [vmem:[%s3749_s1 + $0x2f0] sm:$0xff] }
  0x78   :  { %1062 = vmatprep.subr.mxu0 %v147_v38  ;;  %1133 = vmatprep.subr.mxu1 %v149_v39  ;;  %v99_v50 = vld [vmem:[%s3749_s1 + $0x268] sm:$0xff]  ;;  %v101_v51 = vld [vmem:[%s3749_s1 + $0x278] sm:$0xff]  ;;  %v98_v52 = vld [vmem:[%s3749_s1 + $0x260] sm:$0xff] }
  0x79   :  { %1063 = vmatpush1.msra.mxu0 %v146_v40  ;;  %1134 = vmatpush1.msra.mxu1 %v148_v41  ;;  %v100_v53 = vld [vmem:[%s3749_s1 + $0x270] sm:$0xff]  ;;  %v83_v54 = vld [vmem:[%s3749_s1 + $0x1e8] sm:$0xff]  ;;  %v85_v55 = vld [vmem:[%s3749_s1 + $0x1f8] sm:$0xff] }
  0x7a   :  { %1064 = vmatprep.subr.mxu0 %v131_v42  ;;  %1135 = vmatprep.subr.mxu1 %v133_v43  ;;  %v82_v56 = vld [vmem:[%s3749_s1 + $0x1e0] sm:$0xff]  ;;  %v84_v57 = vld [vmem:[%s3749_s1 + $0x1f0] sm:$0xff]  ;;  %v67_v58 = vld [vmem:[%s3749_s1 + $0x168] sm:$0xff] }
  0x7b   :  { %1065 = vmatpush1.msra.mxu0 %v130_v44  ;;  %1136 = vmatpush1.msra.mxu1 %v132_v45  ;;  %v69_v59 = vld [vmem:[%s3749_s1 + $0x178] sm:$0xff]  ;;  %v66_v60 = vld [vmem:[%s3749_s1 + $0x160] sm:$0xff]  ;;  %v68_v61 = vld [vmem:[%s3749_s1 + $0x170] sm:$0xff] }
  0x7c   :  { %1066 = vmatprep.subr.mxu0 %v115_v46  ;;  %1137 = vmatprep.subr.mxu1 %v117_v47  ;;  %v51_v62 = vld [vmem:[%s3749_s1 + $0xe8] sm:$0xff]  ;;  %v53_v63 = vld [vmem:[%s3749_s1 + $0xf8] sm:$0xff]  ;;  %v50_v2 = vld [vmem:[%s3749_s1 + $0xe0] sm:$0xff] }
  0x7d   :  { %1067 = vmatpush1.msra.mxu0 %v114_v48  ;;  %1138 = vmatpush1.msra.mxu1 %v116_v49  ;;  %v52_v3 = vld [vmem:[%s3749_s1 + $0xf0] sm:$0xff]  ;;  %v35_v4 = vld [vmem:[%s3749_s1 + $0x68] sm:$0xff]  ;;  %v37_v5 = vld [vmem:[%s3749_s1 + $0x78] sm:$0xff] }
  0x7e   :  { %1068 = vmatprep.subr.mxu0 %v99_v50  ;;  %1139 = vmatprep.subr.mxu1 %v101_v51  ;;  %v34_v6 = vld [vmem:[%s3749_s1 + $0x60] sm:$0xff]  ;;  %v36_v7 = vld [vmem:[%s3749_s1 + $0x70] sm:$0xff]  ;;  %v311_v8 = vld [vmem:[%s3751_s3 + $0xf8] sm:$0xff] }
  0x7f   :  { %1069 = vmatpush1.msra.mxu0 %v98_v52  ;;  %1140 = vmatpush1.msra.mxu1 %v100_v53  ;;  %v343_v9 = vld [vmem:[%s3751_s3 + $0x1f8] sm:$0xff]  ;;  %v310_v12 = vld [vmem:[%s3751_s3 + $0xf0] sm:$0xff]  ;;  %v341_v15 = vld [vmem:[%s3751_s3 + $0x1e8] sm:$0xff] }
  0x80   :  { %1070 = vmatprep.subr.mxu0 %v83_v54  ;;  %1141 = vmatprep.subr.mxu1 %v85_v55  ;;  %v295_v10 = vld [vmem:[%s3751_s3 + $0x78] sm:$0xff]  ;;  %v294_v13 = vld [vmem:[%s3751_s3 + $0x70] sm:$0xff]  ;;  %v293_v16 = vld [vmem:[%s3751_s3 + $0x68] sm:$0xff] }
  0x81   :  { %1071 = vmatpush1.msra.mxu0 %v82_v56  ;;  %1142 = vmatpush1.msra.mxu1 %v84_v57  ;;  %v327_v11 = vld [vmem:[%s3751_s3 + $0x178] sm:$0xff]  ;;  %v326_v14 = vld [vmem:[%s3751_s3 + $0x170] sm:$0xff]  ;;  %v325_v17 = vld [vmem:[%s3751_s3 + $0x168] sm:$0xff] }
  0x82   :  { %1072 = vmatprep.subr.mxu0 %v67_v58  ;;  %1143 = vmatprep.subr.mxu1 %v69_v59  ;;  %v308_v18 = vld [vmem:[%s3751_s3 + $0xe0] sm:$0xff]  ;;  %v307_v22 = vld [vmem:[%s3751_s3 + $0xd8] sm:$0xff]  ;;  %v306_v26 = vld [vmem:[%s3751_s3 + $0xd0] sm:$0xff] }
  0x83   :  { %1073 = vmatpush1.msra.mxu0 %v66_v60  ;;  %1144 = vmatpush1.msra.mxu1 %v68_v61  ;;  %v340_v19 = vld [vmem:[%s3751_s3 + $0x1e0] sm:$0xff]  ;;  %v339_v23 = vld [vmem:[%s3751_s3 + $0x1d8] sm:$0xff]  ;;  %v338_v27 = vld [vmem:[%s3751_s3 + $0x1d0] sm:$0xff] }
  0x84   :  { %1074 = vmatprep.subr.mxu0 %v51_v62  ;;  %1145 = vmatprep.subr.mxu1 %v53_v63  ;;  %v292_v20 = vld [vmem:[%s3751_s3 + $0x60] sm:$0xff]  ;;  %v291_v24 = vld [vmem:[%s3751_s3 + $0x58] sm:$0xff]  ;;  %v290_v28 = vld [vmem:[%s3751_s3 + $0x50] sm:$0xff] }
  0x85   :  { %1075 = vmatpush1.msra.mxu0 %v50_v2  ;;  %1146 = vmatpush1.msra.mxu1 %v52_v3  ;;  %v324_v21 = vld [vmem:[%s3751_s3 + $0x160] sm:$0xff]  ;;  %v323_v25 = vld [vmem:[%s3751_s3 + $0x158] sm:$0xff]  ;;  %v322_v29 = vld [vmem:[%s3751_s3 + $0x150] sm:$0xff] }
  0x86   :  { %1076 = vmatprep.subr.mxu0 %v35_v4  ;;  %1147 = vmatprep.subr.mxu1 %v37_v5  ;;  %v305_v30 = vld [vmem:[%s3751_s3 + $0xc8] sm:$0xff]  ;;  %v304_v34 = vld [vmem:[%s3751_s3 + $0xc0] sm:$0xff]  ;;  %v303_v38 = vld [vmem:[%s3751_s3 + $0xb8] sm:$0xff] }
  0x87   :  { %1077 = vmatpush1.msra.mxu0 %v34_v6  ;;  %1110 = vmatprep.mubr.f32.mxu0 %v2085_v1  ;;  %v337_v31 = vld [vmem:[%s3751_s3 + $0x1c8] sm:$0xff]  ;;  %v336_v35 = vld [vmem:[%s3751_s3 + $0x1c0] sm:$0xff]  ;;  %v335_v39 = vld [vmem:[%s3751_s3 + $0x1b8] sm:$0xff] }
  0x88   :  { %1148 = vmatpush1.msra.mxu1 %v36_v7  ;;  %1181 = vmatprep.mubr.f32.mxu1 %v2085_v1  ;;  %v342_v1 = vld [vmem:[%s3751_s3 + $0x1f0] sm:$0xff]  ;;  %v289_v32 = vld [vmem:[%s3751_s3 + $0x48] sm:$0xff]  ;;  %v288_v36 = vld [vmem:[%s3751_s3 + $0x40] sm:$0xff] }
  0x89   :  { %1111 = vmatmul.mubr.f32.vlgmr.msra.gmra.mxu0 %v2312_v0  ;;  %1182 = vmatmul.mubr.f32.vlgmr.msra.gmra.mxu1 %v2312_v0  ;;  %v309_v0 = vld [vmem:[%s3751_s3 + $0xe8] sm:$0xff]  ;;  %v320_v37 = vld [vmem:[%s3751_s3 + $0x140] sm:$0xff]  ;;  %v287_v40 = vld [vmem:[%s3751_s3 + $0x38] sm:$0xff] }
  0x8a   :  { %1781 = vmatprep.subr.mxu0 %v311_v8  ;;  %1816 = vmatprep.subr.mxu1 %v343_v9  ;;  %v321_v33 = vld [vmem:[%s3751_s3 + $0x148] sm:$0xff]  ;;  %v319_v41 = vld [vmem:[%s3751_s3 + $0x138] sm:$0xff]  ;;  %v302_v42 = vld [vmem:[%s3751_s3 + $0xb0] sm:$0xff] }
  0x8b   :  { %1782 = vmatpush3.msra.mxu0 %v295_v10  ;;  %1817 = vmatpush3.msra.mxu1 %v327_v11  ;;  %v334_v43 = vld [vmem:[%s3751_s3 + $0x1b0] sm:$0xff]  ;;  %v301_v46 = vld [vmem:[%s3751_s3 + $0xa8] sm:$0xff]  ;;  %v300_v50 = vld [vmem:[%s3751_s3 + $0xa0] sm:$0xff]  ;;  %v540_v10 = vlaneseq }
  0x8c   :  { %1783 = vmatprep.subr.mxu0 %v310_v12  ;;  %1818 = vmatprep.subr.mxu1 %v342_v1  ;;  %v286_v44 = vld [vmem:[%s3751_s3 + $0x30] sm:$0xff]  ;;  %v333_v47 = vld [vmem:[%s3751_s3 + $0x1a8] sm:$0xff]  ;;  %v332_v51 = vld [vmem:[%s3751_s3 + $0x1a0] sm:$0xff] }
  0x8d   :  { %1784 = vmatpush3.msra.mxu0 %v294_v13  ;;  %1819 = vmatpush3.msra.mxu1 %v326_v14  ;;  %v318_v45 = vld [vmem:[%s3751_s3 + $0x130] sm:$0xff]  ;;  %v285_v48 = vld [vmem:[%s3751_s3 + $0x28] sm:$0xff]  ;;  %v284_v52 = vld [vmem:[%s3751_s3 + $0x20] sm:$0xff]  ;;  %v3104_v11 = vshrl.u32 %v540_v10, 7 }
  0x8e   :  { %1785 = vmatprep.subr.mxu0 %v309_v0  ;;  %1820 = vmatprep.subr.mxu1 %v341_v15  ;;  %v317_v49 = vld [vmem:[%s3751_s3 + $0x128] sm:$0xff]  ;;  %v316_v53 = vld [vmem:[%s3751_s3 + $0x120] sm:$0xff]  ;;  %v299_v54 = vld [vmem:[%s3751_s3 + $0x98] sm:$0xff] }
  0x8f   :  { %1786 = vmatpush3.msra.mxu0 %v293_v16  ;;  %1821 = vmatpush3.msra.mxu1 %v325_v17  ;;  %v331_v55 = vld [vmem:[%s3751_s3 + $0x198] sm:$0xff]  ;;  %v298_v58 = vld [vmem:[%s3751_s3 + $0x90] sm:$0xff]  ;;  %v297_v62 = vld [vmem:[%s3751_s3 + $0x88] sm:$0xff]  ;;  %v550_v12 = vsub.s32 2, %v3104_v11  ;;  %v542_v1 = vsub.s32 0, %v3104_v11  ;;  %v546_v14 = vsub.s32 1, %v3104_v11 }
  0x90   :  { %1787 = vmatprep.subr.mxu0 %v308_v18  ;;  %1822 = vmatprep.subr.mxu1 %v340_v19  ;;  %v283_v56 = vld [vmem:[%s3751_s3 + $0x18] sm:$0xff]  ;;  %v330_v59 = vld [vmem:[%s3751_s3 + $0x190] sm:$0xff]  ;;  %v329_v63 = vld [vmem:[%s3751_s3 + $0x188] sm:$0xff]  ;;  %v554_v0 = vsub.s32 3, %v3104_v11 }
  0x91   :  { %1788 = vmatpush3.msra.mxu0 %v292_v20  ;;  %1823 = vmatpush3.msra.mxu1 %v324_v21  ;;  %v315_v57 = vld [vmem:[%s3751_s3 + $0x118] sm:$0xff]  ;;  %v282_v60 = vld [vmem:[%s3751_s3 + $0x10] sm:$0xff]  ;;  %v281_v2 = vld [vmem:[%s3751_s3 + $0x8] sm:$0xff] }
  0x92   :  { %1789 = vmatprep.subr.mxu0 %v307_v22  ;;  %1824 = vmatprep.subr.mxu1 %v339_v23  ;;  %v314_v61 = vld [vmem:[%s3751_s3 + $0x110] sm:$0xff]  ;;  %v313_v3 = vld [vmem:[%s3751_s3 + $0x108] sm:$0xff]  ;;  %v296_v4 = vld [vmem:[%s3751_s3 + $0x80] sm:$0xff] }
  0x93   :  { %1790 = vmatpush3.msra.mxu0 %v291_v24  ;;  %1825 = vmatpush3.msra.mxu1 %v323_v25  ;;  %v328_v5 = vld [vmem:[%s3751_s3 + $0x180] sm:$0xff]  ;;  %v375_v8 = vld [vmem:[%s3751_s3 + $0x2f8] sm:$0xff]  ;;  %v381_v10 = vld [vmem:[%s3751_s3 + $0x328] sm:$0xff] }
  0x94   :  { %1791 = vmatprep.subr.mxu0 %v306_v26  ;;  %1826 = vmatprep.subr.mxu1 %v338_v27  ;;  %v280_v6 = vld [vmem:[%s3751_s3] sm:$0xff]  ;;  %v407_v9 = vld [vmem:[%s3751_s3 + $0x3f8] sm:$0xff] }
  0x95   :  { %1792 = vmatpush3.msra.mxu0 %v290_v28  ;;  %1827 = vmatpush3.msra.mxu1 %v322_v29  ;;  %v312_v7 = vld [vmem:[%s3751_s3 + $0x100] sm:$0xff] }
  0x96   :  { %1793 = vmatprep.subr.mxu0 %v305_v30  ;;  %1828 = vmatprep.subr.mxu1 %v337_v31  ;;  %v3111_v13 = vld [vmem:[%s3750_s2] sm:$0xff]  ;;  %v359_v31 = vld [vmem:[%s3751_s3 + $0x278] sm:$0xff] }
  0x97   :  { %1794 = vmatpush3.msra.mxu0 %v289_v32  ;;  %1829 = vmatpush3.msra.mxu1 %v321_v33  ;;  %v551_v15 = vrot.slane %v3111_v13, %v550_v12  ;;  %v543_v16 = vrot.slane %v3111_v13, %v542_v1  ;;  %v547_v17 = vrot.slane %v3111_v13, %v546_v14  ;;  %v391_v32 = vld [vmem:[%s3751_s3 + $0x378] sm:$0xff]  ;;  %v374_v33 = vld [vmem:[%s3751_s3 + $0x2f0] sm:$0xff] }
  0x98   :  { %1795 = vmatprep.subr.mxu0 %v304_v34  ;;  %1830 = vmatprep.subr.mxu1 %v336_v35  ;;  %v555_v18 = vrot.slane %v3111_v13, %v554_v0  ;;  %v406_v34 = vld [vmem:[%s3751_s3 + $0x3f0] sm:$0xff] }
  0x99   :  { %1796 = vmatpush3.msra.mxu0 %v288_v36  ;;  %1831 = vmatpush3.msra.mxu1 %v320_v37  ;;  %v358_v35 = vld [vmem:[%s3751_s3 + $0x270] sm:$0xff]  ;;  %v373_v37 = vld [vmem:[%s3751_s3 + $0x2e8] sm:$0xff] }
  0x9a   :  { %1797 = vmatprep.subr.mxu0 %v303_v38  ;;  %1832 = vmatprep.subr.mxu1 %v335_v39  ;;  %v390_v36 = vld [vmem:[%s3751_s3 + $0x370] sm:$0xff]  ;;  %v405_v38 = vld [vmem:[%s3751_s3 + $0x3e8] sm:$0xff] }
  0x9b   :  { %1798 = vmatpush3.msra.mxu0 %v287_v40  ;;  %1833 = vmatpush3.msra.mxu1 %v319_v41  ;;  %v357_v39 = vld [vmem:[%s3751_s3 + $0x268] sm:$0xff]  ;;  %v372_v41 = vld [vmem:[%s3751_s3 + $0x2e0] sm:$0xff] }
  0x9c   :  { %1799 = vmatprep.subr.mxu0 %v302_v42  ;;  %1834 = vmatprep.subr.mxu1 %v334_v43  ;;  %v389_v40 = vld [vmem:[%s3751_s3 + $0x368] sm:$0xff]  ;;  %v404_v42 = vld [vmem:[%s3751_s3 + $0x3e0] sm:$0xff] }
  0x9d   :  { %1800 = vmatpush3.msra.mxu0 %v286_v44  ;;  %1835 = vmatpush3.msra.mxu1 %v318_v45  ;;  %v356_v43 = vld [vmem:[%s3751_s3 + $0x260] sm:$0xff]  ;;  %v371_v45 = vld [vmem:[%s3751_s3 + $0x2d8] sm:$0xff] }
  0x9e   :  { %1801 = vmatprep.subr.mxu0 %v301_v46  ;;  %1836 = vmatprep.subr.mxu1 %v333_v47  ;;  %v388_v44 = vld [vmem:[%s3751_s3 + $0x360] sm:$0xff]  ;;  %v403_v46 = vld [vmem:[%s3751_s3 + $0x3d8] sm:$0xff] }
  0x9f   :  { %1802 = vmatpush3.msra.mxu0 %v285_v48  ;;  %1837 = vmatpush3.msra.mxu1 %v317_v49  ;;  %v355_v47 = vld [vmem:[%s3751_s3 + $0x258] sm:$0xff]  ;;  %v370_v49 = vld [vmem:[%s3751_s3 + $0x2d0] sm:$0xff] }
  0xa0   :  { %1803 = vmatprep.subr.mxu0 %v300_v50  ;;  %1838 = vmatprep.subr.mxu1 %v332_v51  ;;  %v387_v48 = vld [vmem:[%s3751_s3 + $0x358] sm:$0xff]  ;;  %v402_v50 = vld [vmem:[%s3751_s3 + $0x3d0] sm:$0xff] }
  0xa1   :  { %1804 = vmatpush3.msra.mxu0 %v284_v52  ;;  %1839 = vmatpush3.msra.mxu1 %v316_v53  ;;  %v354_v51 = vld [vmem:[%s3751_s3 + $0x250] sm:$0xff]  ;;  %v369_v53 = vld [vmem:[%s3751_s3 + $0x2c8] sm:$0xff] }
  0xa2   :  { %1805 = vmatprep.subr.mxu0 %v299_v54  ;;  %1840 = vmatprep.subr.mxu1 %v331_v55  ;;  %v386_v52 = vld [vmem:[%s3751_s3 + $0x350] sm:$0xff]  ;;  %v401_v54 = vld [vmem:[%s3751_s3 + $0x3c8] sm:$0xff] }
  0xa3   :  { %1806 = vmatpush3.msra.mxu0 %v283_v56  ;;  %1841 = vmatpush3.msra.mxu1 %v315_v57  ;;  %v353_v55 = vld [vmem:[%s3751_s3 + $0x248] sm:$0xff]  ;;  %v368_v57 = vld [vmem:[%s3751_s3 + $0x2c0] sm:$0xff] }
  0xa4   :  { %1807 = vmatprep.subr.mxu0 %v298_v58  ;;  %1842 = vmatprep.subr.mxu1 %v330_v59  ;;  %v385_v56 = vld [vmem:[%s3751_s3 + $0x348] sm:$0xff]  ;;  %v400_v58 = vld [vmem:[%s3751_s3 + $0x3c0] sm:$0xff] }
  0xa5   :  { %1808 = vmatpush3.msra.mxu0 %v282_v60  ;;  %1843 = vmatpush3.msra.mxu1 %v314_v61  ;;  %v352_v59 = vld [vmem:[%s3751_s3 + $0x240] sm:$0xff]  ;;  %v367_v61 = vld [vmem:[%s3751_s3 + $0x2b8] sm:$0xff] }
  0xa6   :  { %1809 = vmatprep.subr.mxu0 %v297_v62  ;;  %1844 = vmatprep.subr.mxu1 %v329_v63  ;;  %v384_v60 = vld [vmem:[%s3751_s3 + $0x340] sm:$0xff]  ;;  %v399_v62 = vld [vmem:[%s3751_s3 + $0x3b8] sm:$0xff] }
  0xa7   :  { %1810 = vmatpush3.msra.mxu0 %v281_v2  ;;  %1845 = vmatpush3.msra.mxu1 %v313_v3  ;;  %v351_v63 = vld [vmem:[%s3751_s3 + $0x238] sm:$0xff]  ;;  %v366_v3 = vld [vmem:[%s3751_s3 + $0x2b0] sm:$0xff] }
  0xa8   :  { %1811 = vmatprep.subr.mxu0 %v296_v4  ;;  %1846 = vmatprep.subr.mxu1 %v328_v5  ;;  %v383_v2 = vld [vmem:[%s3751_s3 + $0x338] sm:$0xff]  ;;  %v398_v4 = vld [vmem:[%s3751_s3 + $0x3b0] sm:$0xff] }
  0xa9   :  { %1812 = vmatpush3.msra.mxu0 %v280_v6  ;;  %1847 = vmatpush3.msra.mxu1 %v312_v7  ;;  %v350_v5 = vld [vmem:[%s3751_s3 + $0x230] sm:$0xff]  ;;  %v365_v7 = vld [vmem:[%s3751_s3 + $0x2a8] sm:$0xff] }
  0xaa   :  { %1851 = vmatprep.subr.mxu0 %v375_v8  ;;  %1886 = vmatprep.subr.mxu1 %v407_v9  ;;  %v382_v6 = vld [vmem:[%s3751_s3 + $0x330] sm:$0xff]  ;;  %v397_v8 = vld [vmem:[%s3751_s3 + $0x3a8] sm:$0xff] }
  0xab   :  { %v349_v9 = vld [vmem:[%s3751_s3 + $0x228] sm:$0xff] }
  0xe3   :  { %v686_v19 = vpop.f32.mrf.mxu0  ;;  %v757_v20 = vpop.f32.mrf.mxu1 }
  0xe4   :  { %v758_v21 = vadd.f32 %v757_v20, %v551_v15  ;;  %v687_v22 = vadd.f32 %v686_v19, %v543_v16  ;;  %v364_v15 = vld [vmem:[%s3751_s3 + $0x2a0] sm:$0xff]  ;;  %v558_v20 = vsub.s32 4, %v3104_v11 }
  0xe5   :  { %v688_v23 = vpop.f32.mrf.mxu0  ;;  %v759_v24 = vpop.f32.mrf.mxu1  ;;  %v396_v16 = vld [vmem:[%s3751_s3 + $0x3a0] sm:$0xff] }
  0xe6   :  { %v689_v25 = vadd.f32 %v688_v23, %v547_v17  ;;  %v760_v26 = vadd.f32 %v759_v24, %v555_v18  ;;  %v1190_v27 = vmax.f32 %v758_v21, 0.0  ;;  %v1188_v30 = vmax.f32 %v687_v22, 0.0  ;;  %v348_v18 = vld [vmem:[%s3751_s3 + $0x220] sm:$0xff]  ;;  %v363_v21 = vld [vmem:[%s3751_s3 + $0x298] sm:$0xff] }
  0xe7   :  { %v566_v17 = vsub.s32 6, %v3104_v11  ;;  %v380_v19 = vld [vmem:[%s3751_s3 + $0x320] sm:$0xff]  ;;  %v395_v22 = vld [vmem:[%s3751_s3 + $0x398] sm:$0xff]  ;;  %v562_v23 = vsub.s32 5, %v3104_v11  ;;  %v570_v24 = vsub.s32 7, %v3104_v11  ;;  %v505_v11 = vld [vmem:[%s3751_s3 + $0x708] sm:$0xff] }
  0xe8   :  { %v1189_v28 = vmax.f32 %v689_v25, 0.0  ;;  %v1191_v29 = vmax.f32 %v760_v26, 0.0  ;;  %v347_v25 = vld [vmem:[%s3751_s3 + $0x218] sm:$0xff] }
  0xe9   :  { %v379_v26 = vld [vmem:[%s3751_s3 + $0x318] sm:$0xff] }
  0xea   :  { %1269 = vmatprep.mubr.f32.mxu0 %v1189_v28  ;;  %1339 = vmatprep.mubr.f32.mxu1 %v1191_v29  ;;  %v362_v28 = vld [vmem:[%s3751_s3 + $0x290] sm:$0xff] }
  0xeb   :  { %1270 = vmatmul.mubr.f32.vlgmr.msra.gmra.mxu0 %v1188_v30  ;;  %1340 = vmatmul.mubr.f32.vlgmr.msra.gmra.mxu1 %v1190_v27  ;;  %v567_v27 = vrot.slane %v3111_v13, %v566_v17  ;;  %v394_v29 = vld [vmem:[%s3751_s3 + $0x390] sm:$0xff]  ;;  %v559_v30 = vrot.slane %v3111_v13, %v558_v20 }
  0xec   :  { %1852 = vmatpush3.msra.mxu0 %v359_v31  ;;  %1887 = vmatpush3.msra.mxu1 %v391_v32  ;;  %v346_v31 = vld [vmem:[%s3751_s3 + $0x210] sm:$0xff] }
  0xed   :  { %1853 = vmatprep.subr.mxu0 %v374_v33  ;;  %1888 = vmatprep.subr.mxu1 %v406_v34  ;;  %v378_v32 = vld [vmem:[%s3751_s3 + $0x310] sm:$0xff]  ;;  %v563_v33 = vrot.slane %v3111_v13, %v562_v23  ;;  %v571_v34 = vrot.slane %v3111_v13, %v570_v24  ;;  %v377_v13 = vld [vmem:[%s3751_s3 + $0x308] sm:$0xff] }
  0xee   :  { %1854 = vmatpush3.msra.mxu0 %v358_v35  ;;  %1889 = vmatpush3.msra.mxu1 %v390_v36  ;;  %v361_v35 = vld [vmem:[%s3751_s3 + $0x288] sm:$0xff] }
  0xef   :  { %1855 = vmatprep.subr.mxu0 %v373_v37  ;;  %1890 = vmatprep.subr.mxu1 %v405_v38  ;;  %v393_v36 = vld [vmem:[%s3751_s3 + $0x388] sm:$0xff] }
  0xf0   :  { %1856 = vmatpush3.msra.mxu0 %v357_v39  ;;  %1891 = vmatpush3.msra.mxu1 %v389_v40  ;;  %v345_v39 = vld [vmem:[%s3751_s3 + $0x208] sm:$0xff] }
  0xf1   :  { %1857 = vmatprep.subr.mxu0 %v372_v41  ;;  %1892 = vmatprep.subr.mxu1 %v404_v42  ;;  %v360_v41 = vld [vmem:[%s3751_s3 + $0x280] sm:$0xff] }
  0xf2   :  { %1858 = vmatpush3.msra.mxu0 %v356_v43  ;;  %1893 = vmatpush3.msra.mxu1 %v388_v44  ;;  %v392_v42 = vld [vmem:[%s3751_s3 + $0x380] sm:$0xff] }
  0xf3   :  { %1859 = vmatprep.subr.mxu0 %v371_v45  ;;  %1894 = vmatprep.subr.mxu1 %v403_v46  ;;  %v344_v46 = vld [vmem:[%s3751_s3 + $0x200] sm:$0xff] }
  0xf4   :  { %1860 = vmatpush3.msra.mxu0 %v355_v47  ;;  %1895 = vmatpush3.msra.mxu1 %v387_v48  ;;  %v376_v47 = vld [vmem:[%s3751_s3 + $0x300] sm:$0xff] }
  0xf5   :  { %1861 = vmatprep.subr.mxu0 %v370_v49  ;;  %1896 = vmatprep.subr.mxu1 %v402_v50  ;;  %v439_v50 = vld [vmem:[%s3751_s3 + $0x4f8] sm:$0xff] }
  0xf6   :  { %1862 = vmatpush3.msra.mxu0 %v354_v51  ;;  %1897 = vmatpush3.msra.mxu1 %v386_v52  ;;  %v471_v51 = vld [vmem:[%s3751_s3 + $0x5f8] sm:$0xff] }
  0xf7   :  { %1863 = vmatprep.subr.mxu0 %v369_v53  ;;  %1898 = vmatprep.subr.mxu1 %v401_v54 }
  0xf8   :  { %1864 = vmatpush3.msra.mxu0 %v353_v55  ;;  %1899 = vmatpush3.msra.mxu1 %v385_v56  ;;  %v423_v56 = vld [vmem:[%s3751_s3 + $0x478] sm:$0xff] }
  0xf9   :  { %1865 = vmatprep.subr.mxu0 %v368_v57  ;;  %1900 = vmatprep.subr.mxu1 %v400_v58  ;;  %v455_v57 = vld [vmem:[%s3751_s3 + $0x578] sm:$0xff]  ;;  %v438_v58 = vld [vmem:[%s3751_s3 + $0x4f0] sm:$0xff] }
  0xfa   :  { %1866 = vmatpush3.msra.mxu0 %v352_v59  ;;  %1901 = vmatpush3.msra.mxu1 %v384_v60  ;;  %v470_v59 = vld [vmem:[%s3751_s3 + $0x5f0] sm:$0xff] }
  0xfb   :  { %1867 = vmatprep.subr.mxu0 %v367_v61  ;;  %1902 = vmatprep.subr.mxu1 %v399_v62  ;;  %v422_v60 = vld [vmem:[%s3751_s3 + $0x470] sm:$0xff]  ;;  %v437_v62 = vld [vmem:[%s3751_s3 + $0x4e8] sm:$0xff] }
  0xfc   :  { %1868 = vmatpush3.msra.mxu0 %v351_v63  ;;  %1903 = vmatpush3.msra.mxu1 %v383_v2  ;;  %v454_v61 = vld [vmem:[%s3751_s3 + $0x570] sm:$0xff]  ;;  %v469_v63 = vld [vmem:[%s3751_s3 + $0x5e8] sm:$0xff] }
  0xfd   :  { %1869 = vmatprep.subr.mxu0 %v366_v3  ;;  %1904 = vmatprep.subr.mxu1 %v398_v4  ;;  %v421_v2 = vld [vmem:[%s3751_s3 + $0x468] sm:$0xff]  ;;  %v436_v4 = vld [vmem:[%s3751_s3 + $0x4e0] sm:$0xff] }
  0xfe   :  { %1870 = vmatpush3.msra.mxu0 %v350_v5  ;;  %1905 = vmatpush3.msra.mxu1 %v382_v6  ;;  %v453_v3 = vld [vmem:[%s3751_s3 + $0x568] sm:$0xff]  ;;  %v468_v5 = vld [vmem:[%s3751_s3 + $0x5e0] sm:$0xff] }
  0xff   :  { %1871 = vmatprep.subr.mxu0 %v365_v7  ;;  %1906 = vmatprep.subr.mxu1 %v397_v8  ;;  %v420_v6 = vld [vmem:[%s3751_s3 + $0x460] sm:$0xff]  ;;  %v435_v8 = vld [vmem:[%s3751_s3 + $0x4d8] sm:$0xff] }
 0x100   :  { %1872 = vmatpush3.msra.mxu0 %v349_v9  ;;  %1907 = vmatpush3.msra.mxu1 %v381_v10  ;;  %v452_v7 = vld [vmem:[%s3751_s3 + $0x560] sm:$0xff]  ;;  %v467_v9 = vld [vmem:[%s3751_s3 + $0x5d8] sm:$0xff] }
 0x101   :  { %1873 = vmatprep.subr.mxu0 %v364_v15  ;;  %1908 = vmatprep.subr.mxu1 %v396_v16  ;;  %v419_v10 = vld [vmem:[%s3751_s3 + $0x458] sm:$0xff]  ;;  %v434_v16 = vld [vmem:[%s3751_s3 + $0x4d0] sm:$0xff] }
 0x102   :  { %1874 = vmatpush3.msra.mxu0 %v348_v18  ;;  %1909 = vmatpush3.msra.mxu1 %v380_v19  ;;  %v451_v15 = vld [vmem:[%s3751_s3 + $0x558] sm:$0xff]  ;;  %v466_v18 = vld [vmem:[%s3751_s3 + $0x5d0] sm:$0xff] }
 0x103   :  { %1875 = vmatprep.subr.mxu0 %v363_v21  ;;  %1910 = vmatprep.subr.mxu1 %v395_v22  ;;  %v418_v19 = vld [vmem:[%s3751_s3 + $0x450] sm:$0xff]  ;;  %v433_v22 = vld [vmem:[%s3751_s3 + $0x4c8] sm:$0xff] }
 0x104   :  { %1876 = vmatpush3.msra.mxu0 %v347_v25  ;;  %1911 = vmatpush3.msra.mxu1 %v379_v26  ;;  %v450_v21 = vld [vmem:[%s3751_s3 + $0x550] sm:$0xff]  ;;  %v465_v25 = vld [vmem:[%s3751_s3 + $0x5c8] sm:$0xff] }
 0x105   :  { %v828_v37 = vpop.f32.mrf.mxu0  ;;  %v899_v38 = vpop.f32.mrf.mxu1  ;;  %1877 = vmatprep.subr.mxu0 %v362_v28  ;;  %1912 = vmatprep.subr.mxu1 %v394_v29  ;;  %v417_v26 = vld [vmem:[%s3751_s3 + $0x448] sm:$0xff]  ;;  %v432_v28 = vld [vmem:[%s3751_s3 + $0x4c0] sm:$0xff] }
 0x106   :  { %v900_v40 = vadd.f32 %v899_v38, %v567_v27  ;;  %1878 = vmatpush3.msra.mxu0 %v346_v31  ;;  %1913 = vmatpush3.msra.mxu1 %v378_v32  ;;  %v829_v43 = vadd.f32 %v828_v37, %v559_v30  ;;  %v449_v27 = vld [vmem:[%s3751_s3 + $0x548] sm:$0xff]  ;;  %v464_v29 = vld [vmem:[%s3751_s3 + $0x5c0] sm:$0xff]  ;;  %v431_v32 = vld [vmem:[%s3751_s3 + $0x4b8] sm:$0xff] }
 0x107   :  { %v830_v44 = vpop.f32.mrf.mxu0  ;;  %v901_v45 = vpop.f32.mrf.mxu1  ;;  %1879 = vmatprep.subr.mxu0 %v361_v35  ;;  %1914 = vmatprep.subr.mxu1 %v393_v36  ;;  %v416_v30 = vld [vmem:[%s3751_s3 + $0x440] sm:$0xff]  ;;  %v447_v35 = vld [vmem:[%s3751_s3 + $0x538] sm:$0xff]  ;;  %v430_v36 = vld [vmem:[%s3751_s3 + $0x4b0] sm:$0xff] }
 0x108   :  { %v831_v48 = vadd.f32 %v830_v44, %v563_v33  ;;  %v902_v49 = vadd.f32 %v901_v45, %v571_v34  ;;  %1880 = vmatpush3.msra.mxu0 %v345_v39  ;;  %1915 = vmatpush3.msra.mxu1 %v377_v13  ;;  %v1194_v52 = vmax.f32 %v900_v40, 0.0  ;;  %v1192_v55 = vmax.f32 %v829_v43, 0.0  ;;  %v448_v31 = vld [vmem:[%s3751_s3 + $0x540] sm:$0xff]  ;;  %v463_v33 = vld [vmem:[%s3751_s3 + $0x5b8] sm:$0xff]  ;;  %v462_v37 = vld [vmem:[%s3751_s3 + $0x5b0] sm:$0xff] }
 0x109   :  { %1881 = vmatprep.subr.mxu0 %v360_v41  ;;  %1916 = vmatprep.subr.mxu1 %v392_v42  ;;  %v415_v34 = vld [vmem:[%s3751_s3 + $0x438] sm:$0xff]  ;;  %v414_v38 = vld [vmem:[%s3751_s3 + $0x430] sm:$0xff]  ;;  %v429_v13 = vld [vmem:[%s3751_s3 + $0x4a8] sm:$0xff] }
 0x10a   :  { %v1193_v53 = vmax.f32 %v831_v48, 0.0  ;;  %v1195_v54 = vmax.f32 %v902_v49, 0.0  ;;  %1882 = vmatpush3.msra.mxu0 %v344_v46  ;;  %1917 = vmatpush3.msra.mxu1 %v376_v47  ;;  %v446_v39 = vld [vmem:[%s3751_s3 + $0x530] sm:$0xff]  ;;  %v461_v40 = vld [vmem:[%s3751_s3 + $0x5a8] sm:$0xff]  ;;  %v428_v43 = vld [vmem:[%s3751_s3 + $0x4a0] sm:$0xff] }
 0x10b   :  { %1921 = vmatprep.subr.mxu0 %v439_v50  ;;  %1956 = vmatprep.subr.mxu1 %v471_v51  ;;  %v413_v41 = vld [vmem:[%s3751_s3 + $0x428] sm:$0xff]  ;;  %v460_v44 = vld [vmem:[%s3751_s3 + $0x5a0] sm:$0xff]  ;;  %v427_v48 = vld [vmem:[%s3751_s3 + $0x498] sm:$0xff] }
 0x10c   :  { %1409 = vmatprep.mubr.f32.mxu0 %v1193_v53  ;;  %1479 = vmatprep.mubr.f32.mxu1 %v1195_v54  ;;  %v445_v42 = vld [vmem:[%s3751_s3 + $0x528] sm:$0xff]  ;;  %v412_v45 = vld [vmem:[%s3751_s3 + $0x420] sm:$0xff]  ;;  %v459_v49 = vld [vmem:[%s3751_s3 + $0x598] sm:$0xff] }
 0x10d   :  { %1410 = vmatmul.mubr.f32.vlgmr.msra.gmra.mxu0 %v1192_v55  ;;  %1480 = vmatmul.mubr.f32.vlgmr.msra.gmra.mxu1 %v1194_v52  ;;  %v444_v46 = vld [vmem:[%s3751_s3 + $0x520] sm:$0xff]  ;;  %v3476_v47 = vld [vmem:[%s3750_s2 + $0x8] sm:$0xff]  ;;  %v411_v50 = vld [vmem:[%s3751_s3 + $0x418] sm:$0xff] }
 0x10e   :  { %1922 = vmatpush3.msra.mxu0 %v423_v56  ;;  %1957 = vmatpush3.msra.mxu1 %v455_v57  ;;  %v443_v51 = vld [vmem:[%s3751_s3 + $0x518] sm:$0xff]  ;;  %v583_v52 = vrot.slane %v3476_v47, %v550_v12  ;;  %v426_v53 = vld [vmem:[%s3751_s3 + $0x490] sm:$0xff]  ;;  %v575_v55 = vrot.slane %v3476_v47, %v542_v1  ;;  %v579_v57 = vrot.slane %v3476_v47, %v546_v14  ;;  %v409_v14 = vld [vmem:[%s3751_s3 + $0x408] sm:$0xff] }
 0x10f   :  { %1923 = vmatprep.subr.mxu0 %v438_v58  ;;  %1958 = vmatprep.subr.mxu1 %v470_v59  ;;  %v458_v54 = vld [vmem:[%s3751_s3 + $0x590] sm:$0xff]  ;;  %v587_v1 = vrot.slane %v3476_v47, %v554_v0  ;;  %v425_v58 = vld [vmem:[%s3751_s3 + $0x488] sm:$0xff] }
 0x110   :  { %1924 = vmatpush3.msra.mxu0 %v422_v60  ;;  %1959 = vmatpush3.msra.mxu1 %v454_v61  ;;  %v410_v56 = vld [vmem:[%s3751_s3 + $0x410] sm:$0xff]  ;;  %v457_v59 = vld [vmem:[%s3751_s3 + $0x588] sm:$0xff] }
 0x111   :  { %1925 = vmatprep.subr.mxu0 %v437_v62  ;;  %1960 = vmatprep.subr.mxu1 %v469_v63  ;;  %v442_v12 = vld [vmem:[%s3751_s3 + $0x510] sm:$0xff]  ;;  %v441_v0 = vld [vmem:[%s3751_s3 + $0x508] sm:$0xff]  ;;  %v424_v63 = vld [vmem:[%s3751_s3 + $0x480] sm:$0xff] }
 0x112   :  { %1926 = vmatpush3.msra.mxu0 %v421_v2  ;;  %1961 = vmatpush3.msra.mxu1 %v453_v3  ;;  %v456_v2 = vld [vmem:[%s3751_s3 + $0x580] sm:$0xff] }
 0x113   :  { %1927 = vmatprep.subr.mxu0 %v436_v4  ;;  %1962 = vmatprep.subr.mxu1 %v468_v5 }
 0x114   :  { %1928 = vmatpush3.msra.mxu0 %v420_v6  ;;  %1963 = vmatpush3.msra.mxu1 %v452_v7  ;;  %v408_v6 = vld [vmem:[%s3751_s3 + $0x400] sm:$0xff] }
 0x115   :  { %1929 = vmatprep.subr.mxu0 %v435_v8  ;;  %1964 = vmatprep.subr.mxu1 %v467_v9  ;;  %v440_v7 = vld [vmem:[%s3751_s3 + $0x500] sm:$0xff] }
 0x116   :  { %1930 = vmatpush3.msra.mxu0 %v419_v10  ;;  %1965 = vmatpush3.msra.mxu1 %v451_v15  ;;  %v503_v10 = vld [vmem:[%s3751_s3 + $0x6f8] sm:$0xff] }
 0x117   :  { %1931 = vmatprep.subr.mxu0 %v434_v16  ;;  %1966 = vmatprep.subr.mxu1 %v466_v18  ;;  %v535_v15 = vld [vmem:[%s3751_s3 + $0x7f8] sm:$0xff] }
 0x118   :  { %1932 = vmatpush3.msra.mxu0 %v418_v19  ;;  %1967 = vmatpush3.msra.mxu1 %v450_v21 }
 0x119   :  { %1933 = vmatprep.subr.mxu0 %v433_v22  ;;  %1968 = vmatprep.subr.mxu1 %v465_v25  ;;  %v487_v22 = vld [vmem:[%s3751_s3 + $0x678] sm:$0xff] }
 0x11a   :  { %1934 = vmatpush3.msra.mxu0 %v417_v26  ;;  %1969 = vmatpush3.msra.mxu1 %v449_v27  ;;  %v519_v25 = vld [vmem:[%s3751_s3 + $0x778] sm:$0xff]  ;;  %v502_v26 = vld [vmem:[%s3751_s3 + $0x6f0] sm:$0xff] }
 0x11b   :  { %1935 = vmatprep.subr.mxu0 %v432_v28  ;;  %1970 = vmatprep.subr.mxu1 %v464_v29  ;;  %v534_v27 = vld [vmem:[%s3751_s3 + $0x7f0] sm:$0xff] }
 0x11c   :  { %1936 = vmatpush3.msra.mxu0 %v416_v30  ;;  %1971 = vmatpush3.msra.mxu1 %v448_v31  ;;  %v486_v28 = vld [vmem:[%s3751_s3 + $0x670] sm:$0xff]  ;;  %v501_v30 = vld [vmem:[%s3751_s3 + $0x6e8] sm:$0xff] }
 0x11d   :  { %1937 = vmatprep.subr.mxu0 %v431_v32  ;;  %1972 = vmatprep.subr.mxu1 %v463_v33  ;;  %v518_v29 = vld [vmem:[%s3751_s3 + $0x770] sm:$0xff]  ;;  %v533_v31 = vld [vmem:[%s3751_s3 + $0x7e8] sm:$0xff] }
 0x11e   :  { %1938 = vmatpush3.msra.mxu0 %v415_v34  ;;  %1973 = vmatpush3.msra.mxu1 %v447_v35  ;;  %v485_v32 = vld [vmem:[%s3751_s3 + $0x668] sm:$0xff]  ;;  %v500_v34 = vld [vmem:[%s3751_s3 + $0x6e0] sm:$0xff] }
 0x11f   :  { %1939 = vmatprep.subr.mxu0 %v430_v36  ;;  %1974 = vmatprep.subr.mxu1 %v462_v37  ;;  %v517_v33 = vld [vmem:[%s3751_s3 + $0x768] sm:$0xff]  ;;  %v532_v35 = vld [vmem:[%s3751_s3 + $0x7e0] sm:$0xff] }
 0x120   :  { %1940 = vmatpush3.msra.mxu0 %v414_v38  ;;  %1975 = vmatpush3.msra.mxu1 %v446_v39  ;;  %v484_v36 = vld [vmem:[%s3751_s3 + $0x660] sm:$0xff]  ;;  %v499_v38 = vld [vmem:[%s3751_s3 + $0x6d8] sm:$0xff] }
 0x121   :  { %1941 = vmatprep.subr.mxu0 %v429_v13  ;;  %1976 = vmatprep.subr.mxu1 %v461_v40  ;;  %v516_v37 = vld [vmem:[%s3751_s3 + $0x760] sm:$0xff]  ;;  %v531_v39 = vld [vmem:[%s3751_s3 + $0x7d8] sm:$0xff] }
 0x122   :  { %1942 = vmatpush3.msra.mxu0 %v413_v41  ;;  %1977 = vmatpush3.msra.mxu1 %v445_v42  ;;  %v483_v13 = vld [vmem:[%s3751_s3 + $0x658] sm:$0xff]  ;;  %v498_v41 = vld [vmem:[%s3751_s3 + $0x6d0] sm:$0xff] }
 0x123   :  { %1943 = vmatprep.subr.mxu0 %v428_v43  ;;  %1978 = vmatprep.subr.mxu1 %v460_v44  ;;  %v515_v40 = vld [vmem:[%s3751_s3 + $0x758] sm:$0xff]  ;;  %v530_v42 = vld [vmem:[%s3751_s3 + $0x7d0] sm:$0xff] }
 0x124   :  { %1944 = vmatpush3.msra.mxu0 %v412_v45  ;;  %1979 = vmatpush3.msra.mxu1 %v444_v46  ;;  %v482_v43 = vld [vmem:[%s3751_s3 + $0x650] sm:$0xff]  ;;  %v497_v45 = vld [vmem:[%s3751_s3 + $0x6c8] sm:$0xff] }
 0x125   :  { %1945 = vmatprep.subr.mxu0 %v427_v48  ;;  %1980 = vmatprep.subr.mxu1 %v459_v49  ;;  %v514_v44 = vld [vmem:[%s3751_s3 + $0x750] sm:$0xff]  ;;  %v529_v46 = vld [vmem:[%s3751_s3 + $0x7c8] sm:$0xff] }
 0x126   :  { %1946 = vmatpush3.msra.mxu0 %v411_v50  ;;  %1981 = vmatpush3.msra.mxu1 %v443_v51  ;;  %v481_v48 = vld [vmem:[%s3751_s3 + $0x648] sm:$0xff]  ;;  %v496_v50 = vld [vmem:[%s3751_s3 + $0x6c0] sm:$0xff] }
 0x127   :  { %v970_v60 = vpop.f32.mrf.mxu0  ;;  %v1041_v61 = vpop.f32.mrf.mxu1  ;;  %1947 = vmatprep.subr.mxu0 %v426_v53  ;;  %1982 = vmatprep.subr.mxu1 %v458_v54  ;;  %v513_v49 = vld [vmem:[%s3751_s3 + $0x748] sm:$0xff]  ;;  %v528_v51 = vld [vmem:[%s3751_s3 + $0x7c0] sm:$0xff]  ;;  %v495_v54 = vld [vmem:[%s3751_s3 + $0x6b8] sm:$0xff] }
 0x128   :  { %v1042_v62 = vadd.f32 %v1041_v61, %v583_v52  ;;  %1948 = vmatpush3.msra.mxu0 %v410_v56  ;;  %1983 = vmatpush3.msra.mxu1 %v442_v12  ;;  %v971_v3 = vadd.f32 %v970_v60, %v575_v55  ;;  %v480_v52 = vld [vmem:[%s3751_s3 + $0x640] sm:$0xff]  ;;  %v527_v55 = vld [vmem:[%s3751_s3 + $0x7b8] sm:$0xff]  ;;  %v493_v60 = vld [vmem:[%s3751_s3 + $0x6a8] sm:$0xff] }
 0x129   :  { %v972_v4 = vpop.f32.mrf.mxu0  ;;  %v1043_v5 = vpop.f32.mrf.mxu1  ;;  %1949 = vmatprep.subr.mxu0 %v425_v58  ;;  %1984 = vmatprep.subr.mxu1 %v457_v59  ;;  %v512_v53 = vld [vmem:[%s3751_s3 + $0x740] sm:$0xff]  ;;  %v479_v56 = vld [vmem:[%s3751_s3 + $0x638] sm:$0xff]  ;;  %v478_v58 = vld [vmem:[%s3751_s3 + $0x630] sm:$0xff] }
 0x12a   :  { %v973_v8 = vadd.f32 %v972_v4, %v579_v57  ;;  %v1044_v9 = vadd.f32 %v1043_v5, %v587_v1  ;;  %1950 = vmatpush3.msra.mxu0 %v409_v14  ;;  %1985 = vmatpush3.msra.mxu1 %v441_v0  ;;  %v1198_v16 = vmax.f32 %v1042_v62, 0.0  ;;  %v1196_v21 = vmax.f32 %v971_v3, 0.0  ;;  %v511_v12 = vld [vmem:[%s3751_s3 + $0x738] sm:$0xff]  ;;  %v494_v57 = vld [vmem:[%s3751_s3 + $0x6b0] sm:$0xff]  ;;  %v525_v61 = vld [vmem:[%s3751_s3 + $0x7a8] sm:$0xff] }
 0x12b   :  { %1951 = vmatprep.subr.mxu0 %v424_v63  ;;  %1986 = vmatprep.subr.mxu1 %v456_v2  ;;  %v526_v1 = vld [vmem:[%s3751_s3 + $0x7b0] sm:$0xff]  ;;  %v477_v14 = vld [vmem:[%s3751_s3 + $0x628] sm:$0xff]  ;;  %v492_v62 = vld [vmem:[%s3751_s3 + $0x6a0] sm:$0xff] }
 0x12c   :  { %v1197_v18 = vmax.f32 %v973_v8, 0.0  ;;  %v1199_v19 = vmax.f32 %v1044_v9, 0.0  ;;  %1952 = vmatpush3.msra.mxu0 %v408_v6  ;;  %1987 = vmatpush3.msra.mxu1 %v440_v7  ;;  %v510_v59 = vld [vmem:[%s3751_s3 + $0x730] sm:$0xff]  ;;  %v509_v0 = vld [vmem:[%s3751_s3 + $0x728] sm:$0xff]  ;;  %v524_v63 = vld [vmem:[%s3751_s3 + $0x7a0] sm:$0xff]  ;;  %v599_v8 = vrot.slane %v3476_v47, %v566_v17 }
 0x12d   :  { %1991 = vmatprep.subr.mxu0 %v503_v10  ;;  %2026 = vmatprep.subr.mxu1 %v535_v15  ;;  %v476_v2 = vld [vmem:[%s3751_s3 + $0x620] sm:$0xff]  ;;  %v491_v4 = vld [vmem:[%s3751_s3 + $0x698] sm:$0xff]  ;;  %v490_v9 = vld [vmem:[%s3751_s3 + $0x690] sm:$0xff]  ;;  %v591_v15 = vrot.slane %v3476_v47, %v558_v20  ;;  %v603_v20 = vrot.slane %v3476_v47, %v570_v24 }
 0x12e   :  { %1549 = vmatprep.mubr.f32.mxu0 %v1197_v18  ;;  %1619 = vmatprep.mubr.f32.mxu1 %v1199_v19  ;;  %v508_v3 = vld [vmem:[%s3751_s3 + $0x720] sm:$0xff]  ;;  %v523_v5 = vld [vmem:[%s3751_s3 + $0x798] sm:$0xff]  ;;  %v522_v10 = vld [vmem:[%s3751_s3 + $0x790] sm:$0xff]  ;;  %v595_v18 = vrot.slane %v3476_v47, %v562_v23 }
 0x12f   :  { %1550 = vmatmul.mubr.f32.vlgmr.msra.gmra.mxu0 %v1196_v21  ;;  %1620 = vmatmul.mubr.f32.vlgmr.msra.gmra.mxu1 %v1198_v16  ;;  %v475_v6 = vld [vmem:[%s3751_s3 + $0x618] sm:$0xff]  ;;  %v474_v16 = vld [vmem:[%s3751_s3 + $0x610] sm:$0xff]  ;;  %v489_v19 = vld [vmem:[%s3751_s3 + $0x688] sm:$0xff] }
 0x130   :  { %1992 = vmatpush3.msra.mxu0 %v487_v22  ;;  %2027 = vmatpush3.msra.mxu1 %v519_v25  ;;  %v507_v7 = vld [vmem:[%s3751_s3 + $0x718] sm:$0xff]  ;;  %v506_v17 = vld [vmem:[%s3751_s3 + $0x710] sm:$0xff]  ;;  %v521_v21 = vld [vmem:[%s3751_s3 + $0x788] sm:$0xff] }
 0x131   :  { %1993 = vmatprep.subr.mxu0 %v502_v26  ;;  %2028 = vmatprep.subr.mxu1 %v534_v27  ;;  %v473_v23 = vld [vmem:[%s3751_s3 + $0x608] sm:$0xff]  ;;  %v488_v47 = vld [vmem:[%s3751_s3 + $0x680] sm:$0xff] }
 0x132   :  { %1994 = vmatpush3.msra.mxu0 %v486_v28  ;;  %2029 = vmatpush3.msra.mxu1 %v518_v29  ;;  %v520_v26 = vld [vmem:[%s3751_s3 + $0x780] sm:$0xff] }
 0x133   :  { %1995 = vmatprep.subr.mxu0 %v501_v30  ;;  %2030 = vmatprep.subr.mxu1 %v533_v31  ;;  %v472_v30 = vld [vmem:[%s3751_s3 + $0x600] sm:$0xff] }
 0x134   :  { %1996 = vmatpush3.msra.mxu0 %v485_v32  ;;  %2031 = vmatpush3.msra.mxu1 %v517_v33  ;;  %v504_v31 = vld [vmem:[%s3751_s3 + $0x700] sm:$0xff] }
 0x135   :  { %1997 = vmatprep.subr.mxu0 %v500_v34  ;;  %2032 = vmatprep.subr.mxu1 %v532_v35 }
 0x136   :  { %1998 = vmatpush3.msra.mxu0 %v484_v36  ;;  %2033 = vmatpush3.msra.mxu1 %v516_v37 }
 0x137   :  { %1999 = vmatprep.subr.mxu0 %v499_v38  ;;  %2034 = vmatprep.subr.mxu1 %v531_v39 }
 0x138   :  { %2000 = vmatpush3.msra.mxu0 %v483_v13  ;;  %2035 = vmatpush3.msra.mxu1 %v515_v40 }
 0x139   :  { %2001 = vmatprep.subr.mxu0 %v498_v41  ;;  %2036 = vmatprep.subr.mxu1 %v530_v42  ;;  %v1204_v42 = vstv %s3752_s4  ;;  %s2086_s4 = smov [#allocation3]  }
 0x13a   :  { %2002 = vmatpush3.msra.mxu0 %v482_v43  ;;  %2037 = vmatpush3.msra.mxu1 %v514_v44  ;;  %s1773_s15 = sshll.u32 %s2086_s4, 4  ;;  %s1774_s15 = int_to_ptr.vmem [resolvable:$true] %s1773_s15 }
 0x13b   :  { %2003 = vmatprep.subr.mxu0 %v497_v45  ;;  %2038 = vmatprep.subr.mxu1 %v529_v46  ;;  %s2063_s16 = scalar_lea.vmem %s1774_s15, 16  ;;  %s2067_s17 = scalar_lea.vmem %s1774_s15, 32 }
 0x13c   :  { %2004 = vmatpush3.msra.mxu0 %v481_v48  ;;  %2039 = vmatpush3.msra.mxu1 %v513_v49  ;;  %p2064_p0 = scmp.ne.s32.totalorder %s1774_s15, %s2063_s16  ;;  %p2068_p1 = scmp.lt.s32.totalorder %s1774_s15, %s1774_s15 }
 0x13d   :  { %2005 = vmatprep.subr.mxu0 %v496_v50  ;;  %2040 = vmatprep.subr.mxu1 %v528_v51  ;;  %p2069_p2 = scmp.lt.s32.totalorder %s2067_s17, %s2063_s16 }
 0x13e   :  { %2006 = vmatpush3.msra.mxu0 %v480_v52  ;;  %2041 = vmatpush3.msra.mxu1 %v512_v53 }
 0x13f   :  { %2007 = vmatprep.subr.mxu0 %v495_v54  ;;  %2042 = vmatprep.subr.mxu1 %v527_v55  ;;  %p2070_p3 = por %p2069_p2, %p2068_p1 }
 0x140   :  { %2008 = vmatpush3.msra.mxu0 %v479_v56  ;;  %2043 = vmatpush3.msra.mxu1 %v511_v12 }
 0x141   :  { %2009 = vmatprep.subr.mxu0 %v494_v57  ;;  %2044 = vmatprep.subr.mxu1 %v526_v1  ;;  %p2071_p4 = pnand %p2070_p3, %p2064_p0 }
 0x142   :  { %2010 = vmatpush3.msra.mxu0 %v478_v58  ;;  %2045 = vmatpush3.msra.mxu1 %v510_v59 }
 0x143   :  { %2011 = vmatprep.subr.mxu0 %v493_v60  ;;  %2046 = vmatprep.subr.mxu1 %v525_v61 }
 0x144   :  { %2012 = vmatpush3.msra.mxu0 %v477_v14  ;;  %2047 = vmatpush3.msra.mxu1 %v509_v0 }
 0x145   :  { %2013 = vmatprep.subr.mxu0 %v492_v62  ;;  %2048 = vmatprep.subr.mxu1 %v524_v63 }
 0x146   :  { %2014 = vmatpush3.msra.mxu0 %v476_v2  ;;  %2049 = vmatpush3.msra.mxu1 %v508_v3 }
 0x147   :  { %2015 = vmatprep.subr.mxu0 %v491_v4  ;;  %2050 = vmatprep.subr.mxu1 %v523_v5 }
 0x148   :  { %2016 = vmatpush3.msra.mxu0 %v475_v6  ;;  %2051 = vmatpush3.msra.mxu1 %v507_v7 }
 0x149   :  { %v1112_v22 = vpop.f32.mrf.mxu0  ;;  %v1183_v25 = vpop.f32.mrf.mxu1  ;;  %2017 = vmatprep.subr.mxu0 %v490_v9  ;;  %2052 = vmatprep.subr.mxu1 %v522_v10 }
 0x14a   :  { %v1184_v24 = vadd.f32 %v1183_v25, %v599_v8  ;;  %2018 = vmatpush3.msra.mxu0 %v474_v16  ;;  %2053 = vmatpush3.msra.mxu1 %v506_v17  ;;  %v1113_v27 = vadd.f32 %v1112_v22, %v591_v15 }
 0x14b   :  { %v1114_v28 = vpop.f32.mrf.mxu0  ;;  %v1185_v29 = vpop.f32.mrf.mxu1  ;;  %2019 = vmatprep.subr.mxu0 %v489_v19  ;;  %2054 = vmatprep.subr.mxu1 %v521_v21 }
 0x14c   :  { %v1115_v32 = vadd.f32 %v1114_v28, %v595_v18  ;;  %v1186_v33 = vadd.f32 %v1185_v29, %v603_v20  ;;  %2020 = vmatpush3.msra.mxu0 %v473_v23  ;;  %2055 = vmatpush3.msra.mxu1 %v505_v11  ;;  %v1202_v34 = vmax.f32 %v1184_v24, 0.0  ;;  %v1200_v37 = vmax.f32 %v1113_v27, 0.0 }
 0x14d   :  { %2021 = vmatprep.subr.mxu0 %v488_v47  ;;  %2056 = vmatprep.subr.mxu1 %v520_v26 }
 0x14e   :  { %v1201_v35 = vmax.f32 %v1115_v32, 0.0  ;;  %v1203_v36 = vmax.f32 %v1186_v33, 0.0  ;;  %2022 = vmatpush3.msra.mxu0 %v472_v30  ;;  %2057 = vmatpush3.msra.mxu1 %v504_v31 }
 0x150   :  { %1689 = vmatprep.mubr.f32.mxu0 %v1201_v35  ;;  %1759 = vmatprep.mubr.f32.mxu1 %v1203_v36 }
 0x151   :  { %1690 = vmatmul.mubr.f32.vlgmr.msra.gmra.mxu0 %v1200_v37  ;;  %1760 = vmatmul.mubr.f32.vlgmr.msra.gmra.mxu1 %v1202_v34 }
 0x1ab   :  { %v1813_v38 = vpop.f32.mrf.mxu0  ;;  %v1848_v13 = vpop.f32.mrf.mxu1 }
 0x1ad   :  { %v1814_v39 = vpop.f32.mrf.mxu0  ;;  %v1849_v43 = vpop.f32.mrf.mxu1 }
 0x1ae   :  { %v1815_v41 = vadd.f32 %v1814_v39, %v1813_v38  ;;  %v1850_v49 = vadd.f32 %v1849_v43, %v1848_v13 }
 0x1b0   :  { %v1272_v45 = vadd.f32 %v1815_v41, %v1204_v42 }
 0x1b2   :  { %v1342_v51 = vadd.f32 %v1850_v49, %v1272_v45 }
 0x1cd   :  { %v1883_v40 = vpop.f32.mrf.mxu0  ;;  %v1918_v46 = vpop.f32.mrf.mxu1 }
 0x1cf   :  { %v1884_v44 = vpop.f32.mrf.mxu0  ;;  %v1919_v52 = vpop.f32.mrf.mxu1 }
 0x1d0   :  { %v1885_v50 = vadd.f32 %v1884_v44, %v1883_v40  ;;  %v1920_v56 = vadd.f32 %v1919_v52, %v1918_v46 }
 0x1d2   :  { %v1412_v54 = vadd.f32 %v1885_v50, %v1342_v51 }
 0x1d4   :  { %v1482_v57 = vadd.f32 %v1920_v56, %v1412_v54 }
 0x1ef   :  { %v1953_v48 = vpop.f32.mrf.mxu0  ;;  %v1988_v55 = vpop.f32.mrf.mxu1 }
 0x1f1   :  { %v1954_v53 = vpop.f32.mrf.mxu0  ;;  %v1989_v1 = vpop.f32.mrf.mxu1 }
 0x1f2   :  { %v1955_v12 = vadd.f32 %v1954_v53, %v1953_v48  ;;  %v1990_v61 = vadd.f32 %v1989_v1, %v1988_v55 }
 0x1f4   :  { %v1552_v58 = vadd.f32 %v1955_v12, %v1482_v57 }
 0x1f6   :  { %v1622_v62 = vadd.f32 %v1990_v61, %v1552_v58 }
 0x211   :  { %v2023_v59 = vpop.f32.mrf.mxu0  ;;  %v2058_v60 = vpop.f32.mrf.mxu1 }
 0x213   :  { %v2024_v14 = vpop.f32.mrf.mxu0  ;;  %v2059_v0 = vpop.f32.mrf.mxu1 }
 0x214   :  { %v2025_v63 = vadd.f32 %v2024_v14, %v2023_v59  ;;  %v2060_v3 = vadd.f32 %v2059_v0, %v2058_v60 }
 0x216   :  { %v1692_v2 = vadd.f32 %v2025_v63, %v1622_v62 }
 0x218   :  { %v1762_v4 = vadd.f32 %v2060_v3, %v1692_v2 }
 0x21a   :  { %1766 = vst.msk [vmem:[#allocation3] sm:$0x1] %vm1765_vm0, %v1762_v4 }
 0x21b   :  { %2074 = shalt.err (!%p2071_p4)
}
 0x21c   :  { %1776 = dma.vmem_to_hbm [thread:$0]  %s1774_s15, 16, %s3753_s5, [#allocation4]  }
 0x21d   :  { %2083 = dma.done.wait [#allocation4], 16  }
 0x21e   :  { %2084 = vsyncadd [#allocation4], 4294967280 }
 0x21f   :  { %1780 = vsyncpa [#allocation4], 1 }

</bundles_post_ra>
